<compile_context>
chip_gen: v5e
topology: v5e:2x2
jax: 0.10.0
libtpu: 0.0.40
codegen_flags: <defaults>
</compile_context>

<pallas_src>
import numpy as np
import jax
import jax.numpy as jnp
from jax.experimental import pallas as pl
from jax.experimental.pallas import tpu as pltpu


# ----------------------------- Pallas kernel -------------------------------
def contxe_kernel(dr_ref, di_ref, ehr_ref, ehi_ref, etr_ref, eti_ref,
                  rr_ref, ri_ref, out_ref):
    # dr_ref/di_ref : (TB, W, D)  cos / sin of the window time embeddings
    # e*_ref, r*_ref: (TB, D)     entity / relation embeddings (real / imag)
    # out_ref       : (TB, 1)     score per triple
    d_real = dr_ref[...]
    d_img = di_ref[...]

    ehr = ehr_ref[...]
    ehi = ehi_ref[...]
    etr = etr_ref[...]
    eti = eti_ref[...]
    rr = rr_ref[...]
    ri = ri_ref[...]

    def softmax_w(logits):                       # softmax over the window axis
        m = jnp.max(logits, axis=-1, keepdims=True)
        e = jnp.exp(logits - m)
        return e * pl.reciprocal(jnp.sum(e, axis=-1, keepdims=True),
                                 approx=True)

    def logits(pc, ps):
        # sum_D( pc*d_real + ps*d_img ) -> (TB, W).  W=5 contraction stays on
        # the VPU (mul + lane reduce); the MXU would be idle padding here.
        return jnp.sum(pc[:, None, :] * d_real + ps[:, None, :] * d_img,
                       axis=-1)

    def wsum(a, x):
        # attention-weighted window sum: (TB, W), (TB, W, D) -> (TB, D)
        return jnp.sum(a[:, :, None] * x, axis=1)

    # Attention weights.  <r, rotate(e, d)> is expanded algebraically so no
    # rotated (TB, W, D) tensor is ever materialised — only per-row (TB, D)
    # products and the shared cos/sin blocks.
    a_real = softmax_w(logits(rr * ehr, -(rr * ehi)))   # <r_real, h_real>
    a_img = softmax_w(logits(ri * ehi, ri * ehr))       # <r_img,  h_img>
    b_real = softmax_w(logits(rr * etr, -(rr * eti)))   # <r_real, t_real>
    b_img = softmax_w(logits(ri * eti, ri * etr))       # <r_img,  t_img>

    # Reduce cos/sin over the window first, then rotate with (TB, D) math.
    y_real = ehr * wsum(a_real, d_real) - ehi * wsum(a_real, d_img)
    y_img = ehr * wsum(a_img, d_img) + ehi * wsum(a_img, d_real)
    z_real = etr * wsum(b_real, d_real) - eti * wsum(b_real, d_img)
    z_img = etr * wsum(b_img, d_img) + eti * wsum(b_img, d_real)

    out_real = jnp.sum(jnp.abs(y_real + rr - z_real), axis=-1, keepdims=True)
    out_img = jnp.sum(jnp.abs(y_img + ri + z_img), axis=-1, keepdims=True)
    out_ref[...] = out_real + out_img


def contxe_pallas(d_real, d_img, ehr, ehi, etr, eti, rr, ri, *, block_b):
    Bp, W, D = d_real.shape
    bwd = pl.BlockSpec((block_b, W, D), lambda i: (i, 0, 0))
    bd = pl.BlockSpec((block_b, D), lambda i: (i, 0))
    out = pl.pallas_call(
        contxe_kernel,
        out_shape=jax.ShapeDtypeStruct((Bp, 1), jnp.float32),
        grid=(Bp // block_b,),
        in_specs=[bwd, bwd, bd, bd, bd, bd, bd, bd],
        out_specs=pl.BlockSpec((block_b, 1), lambda i: (i, 0)),
        compiler_params=pltpu.CompilerParams(
            dimension_semantics=("parallel",),      # 2x on v7x (2 TCs/chip)
            vmem_limit_bytes=32 * 1024 * 1024),     # explicit; fits all gens
    )(d_real, d_img, ehr, ehi, etr, eti, rr, ri)
    return out[:, 0]


# ------------------------------- JAX glue -----------------------------------
def _round_up(n, m):
    return ((n + m - 1) // m) * m


def _pad_to(x, axis, size):
    pad = size - x.shape[axis]
    if pad == 0:
        return x
    widths = [(0, 0)] * x.ndim
    widths[axis] = (0, pad)
    return jnp.pad(x, widths)


def make_params(key, n_entity, n_relation, dim, n_day, alpha=0.01):
    r = 6.0 / np.sqrt(dim)
    ks = jax.random.split(key, 6)
    uni = lambda k, shape: jax.random.uniform(k, shape, jnp.float32, -r, r)
    params = dict(
        emb_E_real=uni(ks[0], (n_entity, dim)),
        emb_E_img=uni(ks[1], (n_entity, dim)),
        emb_R_real=uni(ks[2], (n_relation, dim)),
        emb_R_img=uni(ks[3], (n_relation, dim)),
    )
    time_base = uni(ks[4], (dim,))
    time_inc = uni(ks[5], (dim,))
    steps = jnp.arange(n_day + 1, dtype=jnp.float32)[:, None]
    params["time_emb"] = time_base[None, :] + alpha * steps * time_inc[None, :]
    return params


def time_indices(time_idx, window, n_day):
    # mirrors ContxE._get_time_emb index logic
    offsets = jnp.arange(window - 1, -1, -1, dtype=jnp.int32)     # [W-1..0]
    tmp = time_idx[:, None] - offsets[None, :]                     # (B, W)
    tmp = jnp.maximum(tmp, -1)
    return jnp.where(tmp != -1, tmp, n_day)                        # (B, W)


def contxe_forward(params, X, window, n_day, max_block_b=256):
    h_i, t_i, r_i, d_i = X[:, 0], X[:, 1], X[:, 2], X[:, 3]
    B = X.shape[0]

    # cos/sin of the small (n_day+1, D) time table, computed once outside the
    # kernel so the kernel does zero transcendentals.
    cos_tab = jnp.cos(params["time_emb"])
    sin_tab = jnp.sin(params["time_emb"])
    idx = time_indices(d_i, window, n_day)                         # (B, W)
    d_real = cos_tab[idx]                                          # (B, W, D)
    d_img = sin_tab[idx]
    # TODO(synk): gather the cos/sin rows inside the kernel from a
    # VMEM-resident table (scalar-prefetched (B, W) indices) to shrink the
    # dominant HBM stream by ~W x; row-gather kept in JAX here for lowering
    # robustness.

    ehr = params["emb_E_real"][h_i]
    ehi = params["emb_E_img"][h_i]
    etr = params["emb_E_real"][t_i]
    eti = params["emb_E_img"][t_i]
    rr = params["emb_R_real"][r_i]
    ri = params["emb_R_img"][r_i]

    # Pad D to a lane multiple (128) and B to a multiple of the batch tile.
    # Zero-padding is exact here: padded embedding lanes are 0, so they
    # contribute 0 to every logit and to the final L1 sums.
    D = ehr.shape[-1]
    Dp = _round_up(D, 128)
    block_b = min(max_block_b, _round_up(B, 8))
    Bp = _round_up(B, block_b)

    d_real = _pad_to(_pad_to(d_real, 2, Dp), 0, Bp)
    d_img = _pad_to(_pad_to(d_img, 2, Dp), 0, Bp)
    pad2 = lambda x: _pad_to(_pad_to(x, 1, Dp), 0, Bp)
    ehr, ehi, etr, eti, rr, ri = map(pad2, (ehr, ehi, etr, eti, rr, ri))

    out = contxe_pallas(d_real, d_img, ehr, ehi, etr, eti, rr, ri,
                        block_b=block_b)
    return out[:B]


# pure-JAX reference (same math as the PyTorch module) for correctness check
def contxe_reference(params, X, window, n_day):
    h_i, t_i, r_i, d_i = X[:, 0], X[:, 1], X[:, 2], X[:, 3]
    d_list = params["time_emb"][time_indices(d_i, window, n_day)]
    d_img, d_real = jnp.sin(d_list), jnp.cos(d_list)
    ehr = params["emb_E_real"][h_i][:, None, :]
    ehi = params["emb_E_img"][h_i][:, None, :]
    etr = params["emb_E_real"][t_i][:, None, :]
    eti = params["emb_E_img"][t_i][:, None, :]
    rr = params["emb_R_real"][r_i]
    ri = params["emb_R_img"][r_i]
    h_real = ehr * d_real - ehi * d_img
    h_img = ehr * d_img + ehi * d_real
    t_real = etr * d_real - eti * d_img
    t_img = etr * d_img + eti * d_real

    def attend(r, x):
        logits = jnp.sum(r[:, None, :] * x, axis=-1)
        a = jax.nn.softmax(logits, axis=-1)
        return jnp.sum(a[:, :, None] * x, axis=1)

    y_real = attend(rr, h_real)
    y_img = attend(ri, h_img)
    z_real = attend(rr, t_real)
    z_img = attend(ri, t_img)
    out_real = jnp.sum(jnp.abs(y_real + rr - z_real), axis=-1)
    out_img = jnp.sum(jnp.abs(y_img + ri + z_img), axis=-1)
    return out_real + out_img


if __name__ == "__main__":
    # small deterministic config
    n_entity, n_relation, dim, n_day, window, batch = 16, 4, 32, 30, 5, 8

    key = jax.random.PRNGKey(0)
    kp, kh, kt, kr, kd = jax.random.split(key, 5)
    params = make_params(kp, n_entity, n_relation, dim, n_day)

    X = jnp.stack(
        [
            jax.random.randint(kh, (batch,), 0, n_entity),
            jax.random.randint(kt, (batch,), 0, n_entity),
            jax.random.randint(kr, (batch,), 0, n_relation),
            jax.random.randint(kd, (batch,), 0, n_day + 1),
        ],
        axis=1,
    ).astype(jnp.int32)

    out = jax.block_until_ready(contxe_forward(params, X, window, n_day))
    ref = jax.block_until_ready(contxe_reference(params, X, window, n_day))
    # Tolerance loosened vs. 1e-5: the softmax denominator now uses the
    # approximate EUP reciprocal (pl.reciprocal(..., approx=True)).
    np.testing.assert_allclose(np.asarray(out), np.asarray(ref),
                               rtol=1e-2, atol=1e-2)
    print("KERNEL_OK")
</pallas_src>

<mosaic_0001>
module attributes {stable_mosaic.version = 11 : i64} {
  func.func @contxe_kernel(%arg0: i32, %arg1: memref<8x5x128xf32, #tpu.memory_space<vmem>>, %arg2: memref<8x5x128xf32, #tpu.memory_space<vmem>>, %arg3: memref<8x128xf32, #tpu.memory_space<vmem>>, %arg4: memref<8x128xf32, #tpu.memory_space<vmem>>, %arg5: memref<8x128xf32, #tpu.memory_space<vmem>>, %arg6: memref<8x128xf32, #tpu.memory_space<vmem>>, %arg7: memref<8x128xf32, #tpu.memory_space<vmem>>, %arg8: memref<8x128xf32, #tpu.memory_space<vmem>>, %arg9: memref<8x1xf32, #tpu.memory_space<vmem>>) attributes {dimension_semantics = [#tpu.dimension_semantics<parallel>], iteration_bounds = array<i64: 1>, scalar_prefetch = 0 : i64, scratch_operands = 0 : i64, tpu.core_type = #tpu.core_type<tc>, window_params = [{transform_indices = @transform_0, window_bounds = array<i64: 8, 5, 128>}, {transform_indices = @transform_1, window_bounds = array<i64: 8, 5, 128>}, {transform_indices = @transform_2, window_bounds = array<i64: 8, 128>}, {transform_indices = @transform_3, window_bounds = array<i64: 8, 128>}, {transform_indices = @transform_4, window_bounds = array<i64: 8, 128>}, {transform_indices = @transform_5, window_bounds = array<i64: 8, 128>}, {transform_indices = @transform_6, window_bounds = array<i64: 8, 128>}, {transform_indices = @transform_7, window_bounds = array<i64: 8, 128>}, {transform_indices = @transform_8, window_bounds = array<i64: 8, 1>}]} {
    %c0 = arith.constant 0 : index
    %c0_0 = arith.constant 0 : index
    %c0_1 = arith.constant 0 : index
    %0 = vector.load %arg1[%c0, %c0_0, %c0_1] : memref<8x5x128xf32, #tpu.memory_space<vmem>>, vector<8x5x128xf32>
    %c0_2 = arith.constant 0 : index
    %c0_3 = arith.constant 0 : index
    %c0_4 = arith.constant 0 : index
    %1 = vector.load %arg2[%c0_2, %c0_3, %c0_4] : memref<8x5x128xf32, #tpu.memory_space<vmem>>, vector<8x5x128xf32>
    %c0_5 = arith.constant 0 : index
    %c0_6 = arith.constant 0 : index
    %2 = vector.load %arg3[%c0_5, %c0_6] : memref<8x128xf32, #tpu.memory_space<vmem>>, vector<8x128xf32>
    %c0_7 = arith.constant 0 : index
    %c0_8 = arith.constant 0 : index
    %3 = vector.load %arg4[%c0_7, %c0_8] : memref<8x128xf32, #tpu.memory_space<vmem>>, vector<8x128xf32>
    %c0_9 = arith.constant 0 : index
    %c0_10 = arith.constant 0 : index
    %4 = vector.load %arg5[%c0_9, %c0_10] : memref<8x128xf32, #tpu.memory_space<vmem>>, vector<8x128xf32>
    %c0_11 = arith.constant 0 : index
    %c0_12 = arith.constant 0 : index
    %5 = vector.load %arg6[%c0_11, %c0_12] : memref<8x128xf32, #tpu.memory_space<vmem>>, vector<8x128xf32>
    %c0_13 = arith.constant 0 : index
    %c0_14 = arith.constant 0 : index
    %6 = vector.load %arg7[%c0_13, %c0_14] : memref<8x128xf32, #tpu.memory_space<vmem>>, vector<8x128xf32>
    %c0_15 = arith.constant 0 : index
    %c0_16 = arith.constant 0 : index
    %7 = vector.load %arg8[%c0_15, %c0_16] : memref<8x128xf32, #tpu.memory_space<vmem>>, vector<8x128xf32>
    %8 = arith.mulf %6, %2 : vector<8x128xf32>
    %9 = arith.mulf %6, %3 : vector<8x128xf32>
    %cst = arith.constant 0.000000e+00 : f32
    %10 = vector.broadcast %cst : f32 to vector<8x128xf32>
    %11 = arith.subf %10, %9 : vector<8x128xf32>
    %12 = vector.shape_cast %8 : vector<8x128xf32> to vector<8x1x128xf32>
    %13 = vector.broadcast %12 : vector<8x1x128xf32> to vector<8x5x128xf32>
    %14 = arith.mulf %13, %0 : vector<8x5x128xf32>
    %15 = vector.shape_cast %11 : vector<8x128xf32> to vector<8x1x128xf32>
    %16 = vector.broadcast %15 : vector<8x1x128xf32> to vector<8x5x128xf32>
    %17 = arith.mulf %16, %1 : vector<8x5x128xf32>
    %18 = arith.addf %14, %17 : vector<8x5x128xf32>
    %cst_17 = arith.constant dense<0.000000e+00> : vector<8x5xf32>
    %19 = vector.multi_reduction <add>, %18, %cst_17 [2] : vector<8x5x128xf32> to vector<8x5xf32>
    %cst_18 = arith.constant dense<0xFF800000> : vector<8xf32>
    %20 = vector.multi_reduction <maximumf>, %19, %cst_18 [1] : vector<8x5xf32> to vector<8xf32>
    %21 = vector.shape_cast %20 : vector<8xf32> to vector<8x1xf32>
    %22 = vector.broadcast %21 : vector<8x1xf32> to vector<8x5xf32>
    %23 = arith.subf %19, %22 : vector<8x5xf32>
    %24 = math.exp %23 : vector<8x5xf32>
    %cst_19 = arith.constant dense<0.000000e+00> : vector<8xf32>
    %25 = vector.multi_reduction <add>, %24, %cst_19 [1] : vector<8x5xf32> to vector<8xf32>
    %26 = vector.shape_cast %25 : vector<8xf32> to vector<8x1xf32>
    %27 = tpu.reciprocal %26 {approx = true} : vector<8x1xf32> -> vector<8x1xf32>
    %28 = vector.broadcast %27 : vector<8x1xf32> to vector<8x5xf32>
    %29 = arith.mulf %24, %28 : vector<8x5xf32>
    %30 = arith.mulf %7, %3 : vector<8x128xf32>
    %31 = arith.mulf %7, %2 : vector<8x128xf32>
    %32 = vector.shape_cast %30 : vector<8x128xf32> to vector<8x1x128xf32>
    %33 = vector.broadcast %32 : vector<8x1x128xf32> to vector<8x5x128xf32>
    %34 = arith.mulf %33, %0 : vector<8x5x128xf32>
    %35 = vector.shape_cast %31 : vector<8x128xf32> to vector<8x1x128xf32>
    %36 = vector.broadcast %35 : vector<8x1x128xf32> to vector<8x5x128xf32>
    %37 = arith.mulf %36, %1 : vector<8x5x128xf32>
    %38 = arith.addf %34, %37 : vector<8x5x128xf32>
    %cst_20 = arith.constant dense<0.000000e+00> : vector<8x5xf32>
    %39 = vector.multi_reduction <add>, %38, %cst_20 [2] : vector<8x5x128xf32> to vector<8x5xf32>
    %cst_21 = arith.constant dense<0xFF800000> : vector<8xf32>
    %40 = vector.multi_reduction <maximumf>, %39, %cst_21 [1] : vector<8x5xf32> to vector<8xf32>
    %41 = vector.shape_cast %40 : vector<8xf32> to vector<8x1xf32>
    %42 = vector.broadcast %41 : vector<8x1xf32> to vector<8x5xf32>
    %43 = arith.subf %39, %42 : vector<8x5xf32>
    %44 = math.exp %43 : vector<8x5xf32>
    %cst_22 = arith.constant dense<0.000000e+00> : vector<8xf32>
    %45 = vector.multi_reduction <add>, %44, %cst_22 [1] : vector<8x5xf32> to vector<8xf32>
    %46 = vector.shape_cast %45 : vector<8xf32> to vector<8x1xf32>
    %47 = tpu.reciprocal %46 {approx = true} : vector<8x1xf32> -> vector<8x1xf32>
    %48 = vector.broadcast %47 : vector<8x1xf32> to vector<8x5xf32>
    %49 = arith.mulf %44, %48 : vector<8x5xf32>
    %50 = arith.mulf %6, %4 : vector<8x128xf32>
    %51 = arith.mulf %6, %5 : vector<8x128xf32>
    %cst_23 = arith.constant 0.000000e+00 : f32
    %52 = vector.broadcast %cst_23 : f32 to vector<8x128xf32>
    %53 = arith.subf %52, %51 : vector<8x128xf32>
    %54 = vector.shape_cast %50 : vector<8x128xf32> to vector<8x1x128xf32>
    %55 = vector.broadcast %54 : vector<8x1x128xf32> to vector<8x5x128xf32>
    %56 = arith.mulf %55, %0 : vector<8x5x128xf32>
    %57 = vector.shape_cast %53 : vector<8x128xf32> to vector<8x1x128xf32>
    %58 = vector.broadcast %57 : vector<8x1x128xf32> to vector<8x5x128xf32>
    %59 = arith.mulf %58, %1 : vector<8x5x128xf32>
    %60 = arith.addf %56, %59 : vector<8x5x128xf32>
    %cst_24 = arith.constant dense<0.000000e+00> : vector<8x5xf32>
    %61 = vector.multi_reduction <add>, %60, %cst_24 [2] : vector<8x5x128xf32> to vector<8x5xf32>
    %cst_25 = arith.constant dense<0xFF800000> : vector<8xf32>
    %62 = vector.multi_reduction <maximumf>, %61, %cst_25 [1] : vector<8x5xf32> to vector<8xf32>
    %63 = vector.shape_cast %62 : vector<8xf32> to vector<8x1xf32>
    %64 = vector.broadcast %63 : vector<8x1xf32> to vector<8x5xf32>
    %65 = arith.subf %61, %64 : vector<8x5xf32>
    %66 = math.exp %65 : vector<8x5xf32>
    %cst_26 = arith.constant dense<0.000000e+00> : vector<8xf32>
    %67 = vector.multi_reduction <add>, %66, %cst_26 [1] : vector<8x5xf32> to vector<8xf32>
    %68 = vector.shape_cast %67 : vector<8xf32> to vector<8x1xf32>
    %69 = tpu.reciprocal %68 {approx = true} : vector<8x1xf32> -> vector<8x1xf32>
    %70 = vector.broadcast %69 : vector<8x1xf32> to vector<8x5xf32>
    %71 = arith.mulf %66, %70 : vector<8x5xf32>
    %72 = arith.mulf %7, %5 : vector<8x128xf32>
    %73 = arith.mulf %7, %4 : vector<8x128xf32>
    %74 = vector.shape_cast %72 : vector<8x128xf32> to vector<8x1x128xf32>
    %75 = vector.broadcast %74 : vector<8x1x128xf32> to vector<8x5x128xf32>
    %76 = arith.mulf %75, %0 : vector<8x5x128xf32>
    %77 = vector.shape_cast %73 : vector<8x128xf32> to vector<8x1x128xf32>
    %78 = vector.broadcast %77 : vector<8x1x128xf32> to vector<8x5x128xf32>
    %79 = arith.mulf %78, %1 : vector<8x5x128xf32>
    %80 = arith.addf %76, %79 : vector<8x5x128xf32>
    %cst_27 = arith.constant dense<0.000000e+00> : vector<8x5xf32>
    %81 = vector.multi_reduction <add>, %80, %cst_27 [2] : vector<8x5x128xf32> to vector<8x5xf32>
    %cst_28 = arith.constant dense<0xFF800000> : vector<8xf32>
    %82 = vector.multi_reduction <maximumf>, %81, %cst_28 [1] : vector<8x5xf32> to vector<8xf32>
    %83 = vector.shape_cast %82 : vector<8xf32> to vector<8x1xf32>
    %84 = vector.broadcast %83 : vector<8x1xf32> to vector<8x5xf32>
    %85 = arith.subf %81, %84 : vector<8x5xf32>
    %86 = math.exp %85 : vector<8x5xf32>
    %cst_29 = arith.constant dense<0.000000e+00> : vector<8xf32>
    %87 = vector.multi_reduction <add>, %86, %cst_29 [1] : vector<8x5xf32> to vector<8xf32>
    %88 = vector.shape_cast %87 : vector<8xf32> to vector<8x1xf32>
    %89 = tpu.reciprocal %88 {approx = true} : vector<8x1xf32> -> vector<8x1xf32>
    %90 = vector.broadcast %89 : vector<8x1xf32> to vector<8x5xf32>
    %91 = arith.mulf %86, %90 : vector<8x5xf32>
    %92 = vector.shape_cast %29 : vector<8x5xf32> to vector<8x5x1xf32>
    %93 = vector.broadcast %92 : vector<8x5x1xf32> to vector<8x5x128xf32>
    %94 = arith.mulf %93, %0 : vector<8x5x128xf32>
    %cst_30 = arith.constant dense<0.000000e+00> : vector<8x128xf32>
    %95 = vector.multi_reduction <add>, %94, %cst_30 [1] : vector<8x5x128xf32> to vector<8x128xf32>
    %96 = arith.mulf %2, %95 : vector<8x128xf32>
    %97 = vector.shape_cast %29 : vector<8x5xf32> to vector<8x5x1xf32>
    %98 = vector.broadcast %97 : vector<8x5x1xf32> to vector<8x5x128xf32>
    %99 = arith.mulf %98, %1 : vector<8x5x128xf32>
    %cst_31 = arith.constant dense<0.000000e+00> : vector<8x128xf32>
    %100 = vector.multi_reduction <add>, %99, %cst_31 [1] : vector<8x5x128xf32> to vector<8x128xf32>
    %101 = arith.mulf %3, %100 : vector<8x128xf32>
    %102 = arith.subf %96, %101 : vector<8x128xf32>
    %103 = vector.shape_cast %49 : vector<8x5xf32> to vector<8x5x1xf32>
    %104 = vector.broadcast %103 : vector<8x5x1xf32> to vector<8x5x128xf32>
    %105 = arith.mulf %104, %1 : vector<8x5x128xf32>
    %cst_32 = arith.constant dense<0.000000e+00> : vector<8x128xf32>
    %106 = vector.multi_reduction <add>, %105, %cst_32 [1] : vector<8x5x128xf32> to vector<8x128xf32>
    %107 = arith.mulf %2, %106 : vector<8x128xf32>
    %108 = vector.shape_cast %49 : vector<8x5xf32> to vector<8x5x1xf32>
    %109 = vector.broadcast %108 : vector<8x5x1xf32> to vector<8x5x128xf32>
    %110 = arith.mulf %109, %0 : vector<8x5x128xf32>
    %cst_33 = arith.constant dense<0.000000e+00> : vector<8x128xf32>
    %111 = vector.multi_reduction <add>, %110, %cst_33 [1] : vector<8x5x128xf32> to vector<8x128xf32>
    %112 = arith.mulf %3, %111 : vector<8x128xf32>
    %113 = arith.addf %107, %112 : vector<8x128xf32>
    %114 = vector.shape_cast %71 : vector<8x5xf32> to vector<8x5x1xf32>
    %115 = vector.broadcast %114 : vector<8x5x1xf32> to vector<8x5x128xf32>
    %116 = arith.mulf %115, %0 : vector<8x5x128xf32>
    %cst_34 = arith.constant dense<0.000000e+00> : vector<8x128xf32>
    %117 = vector.multi_reduction <add>, %116, %cst_34 [1] : vector<8x5x128xf32> to vector<8x128xf32>
    %118 = arith.mulf %4, %117 : vector<8x128xf32>
    %119 = vector.shape_cast %71 : vector<8x5xf32> to vector<8x5x1xf32>
    %120 = vector.broadcast %119 : vector<8x5x1xf32> to vector<8x5x128xf32>
    %121 = arith.mulf %120, %1 : vector<8x5x128xf32>
    %cst_35 = arith.constant dense<0.000000e+00> : vector<8x128xf32>
    %122 = vector.multi_reduction <add>, %121, %cst_35 [1] : vector<8x5x128xf32> to vector<8x128xf32>
    %123 = arith.mulf %5, %122 : vector<8x128xf32>
    %124 = arith.subf %118, %123 : vector<8x128xf32>
    %125 = vector.shape_cast %91 : vector<8x5xf32> to vector<8x5x1xf32>
    %126 = vector.broadcast %125 : vector<8x5x1xf32> to vector<8x5x128xf32>
    %127 = arith.mulf %126, %1 : vector<8x5x128xf32>
    %cst_36 = arith.constant dense<0.000000e+00> : vector<8x128xf32>
    %128 = vector.multi_reduction <add>, %127, %cst_36 [1] : vector<8x5x128xf32> to vector<8x128xf32>
    %129 = arith.mulf %4, %128 : vector<8x128xf32>
    %130 = vector.shape_cast %91 : vector<8x5xf32> to vector<8x5x1xf32>
    %131 = vector.broadcast %130 : vector<8x5x1xf32> to vector<8x5x128xf32>
    %132 = arith.mulf %131, %0 : vector<8x5x128xf32>
    %cst_37 = arith.constant dense<0.000000e+00> : vector<8x128xf32>
    %133 = vector.multi_reduction <add>, %132, %cst_37 [1] : vector<8x5x128xf32> to vector<8x128xf32>
    %134 = arith.mulf %5, %133 : vector<8x128xf32>
    %135 = arith.addf %129, %134 : vector<8x128xf32>
    %136 = arith.addf %102, %6 : vector<8x128xf32>
    %137 = arith.subf %136, %124 : vector<8x128xf32>
    %138 = math.absf %137 : vector<8x128xf32>
    %cst_38 = arith.constant dense<0.000000e+00> : vector<8xf32>
    %139 = vector.multi_reduction <add>, %138, %cst_38 [1] : vector<8x128xf32> to vector<8xf32>
    %140 = vector.shape_cast %139 : vector<8xf32> to vector<8x1xf32>
    %141 = arith.addf %113, %7 : vector<8x128xf32>
    %142 = arith.addf %141, %135 : vector<8x128xf32>
    %143 = math.absf %142 : vector<8x128xf32>
    %cst_39 = arith.constant dense<0.000000e+00> : vector<8xf32>
    %144 = vector.multi_reduction <add>, %143, %cst_39 [1] : vector<8x128xf32> to vector<8xf32>
    %145 = vector.shape_cast %144 : vector<8xf32> to vector<8x1xf32>
    %146 = arith.addf %140, %145 : vector<8x1xf32>
    %c0_40 = arith.constant 0 : index
    %c0_41 = arith.constant 0 : index
    %147 = vector.load %arg9[%c0_40, %c0_41] : memref<8x1xf32, #tpu.memory_space<vmem>>, vector<8x1xf32>
    tpu.vector_store %arg9[%c0_40, %c0_41], %146 {strides = array<i32>} : memref<8x1xf32, #tpu.memory_space<vmem>>, vector<8x1xf32>,
    return
  }
  func.func @transform_0(%arg0: i32) -> (i32, i32, i32) {
    %c0_i32 = arith.constant 0 : i32
    %c0_i32_0 = arith.constant 0 : i32
    %c0_i32_1 = arith.constant 0 : i32
    return %arg0, %c0_i32, %c0_i32_0 : i32, i32, i32
  }
  func.func @transform_1(%arg0: i32) -> (i32, i32, i32) {
    %c0_i32 = arith.constant 0 : i32
    %c0_i32_0 = arith.constant 0 : i32
    %c0_i32_1 = arith.constant 0 : i32
    return %arg0, %c0_i32, %c0_i32_0 : i32, i32, i32
  }
  func.func @transform_2(%arg0: i32) -> (i32, i32) {
    %c0_i32 = arith.constant 0 : i32
    %c0_i32_0 = arith.constant 0 : i32
    return %arg0, %c0_i32 : i32, i32
  }
  func.func @transform_3(%arg0: i32) -> (i32, i32) {
    %c0_i32 = arith.constant 0 : i32
    %c0_i32_0 = arith.constant 0 : i32
    return %arg0, %c0_i32 : i32, i32
  }
  func.func @transform_4(%arg0: i32) -> (i32, i32) {
    %c0_i32 = arith.constant 0 : i32
    %c0_i32_0 = arith.constant 0 : i32
    return %arg0, %c0_i32 : i32, i32
  }
  func.func @transform_5(%arg0: i32) -> (i32, i32) {
    %c0_i32 = arith.constant 0 : i32
    %c0_i32_0 = arith.constant 0 : i32
    return %arg0, %c0_i32 : i32, i32
  }
  func.func @transform_6(%arg0: i32) -> (i32, i32) {
    %c0_i32 = arith.constant 0 : i32
    %c0_i32_0 = arith.constant 0 : i32
    return %arg0, %c0_i32 : i32, i32
  }
  func.func @transform_7(%arg0: i32) -> (i32, i32) {
    %c0_i32 = arith.constant 0 : i32
    %c0_i32_0 = arith.constant 0 : i32
    return %arg0, %c0_i32 : i32, i32
  }
  func.func @transform_8(%arg0: i32) -> (i32, i32) {
    %c0_i32 = arith.constant 0 : i32
    %c0_i32_0 = arith.constant 0 : i32
    return %arg0, %c0_i32 : i32, i32
  }
}

</mosaic_0001>

<bundles_post_ra>
// kernel: tpu_custom_call.1
= control target key start
LH: loop header
LB: loop body
LE: loop exit
PB: predicated region body
PF: predicated region fallthrough
CT: control target
= control target key end

     0   :  { %vm126_vm0 = vcmask 1044480   ;;  %vm169_vm1 = vcmask 1041409   ;;  %vm171_vm2 = vcmask 1042434   ;;  %vm173_vm3 = vcmask 1043459   ;;  %s3199_s2 = inlined_call_operand.vmem [shape: f32[8,128], index: 2, kind: input, shape index: {}]   ;;  %s3200_s3 = inlined_call_operand.vmem [shape: f32[8,128], index: 3, kind: input, shape index: {}]   ;;  %s3201_s6 = inlined_call_operand.vmem [shape: f32[8,128], index: 6, kind: input, shape index: {}]   ;;  %s3202_s0 = inlined_call_operand.vmem [shape: f32[8,5,128], index: 0, kind: input, shape index: {}]   ;;  %s3203_s1 = inlined_call_operand.vmem [shape: f32[8,5,128], index: 1, kind: input, shape index: {}]   ;;  %s3204_s7 = inlined_call_operand.vmem [shape: f32[8,128], index: 7, kind: input, shape index: {}]   ;;  %s3205_s4 = inlined_call_operand.vmem [shape: f32[8,128], index: 4, kind: input, shape index: {}]   ;;  %s3206_s5 = inlined_call_operand.vmem [shape: f32[8,128], index: 5, kind: input, shape index: {}]   ;;  %s3207_s8 = inlined_call_operand.vmem [shape: f32[8,1], index: 8, kind: output, shape index: {}]  }
   0x1   :  { %v2014_v0 = vld [vmem:[%s3199_s2] sm:$0xff]  ;;  %v2048_v9 = vld [vmem:[%s3202_s0 + $0x10] sm:$0x1f]  ;;  %v2070_v20 = vld [vmem:[%s3202_s0 + $0x8] sm:$0x1f]  ;;  %vm175_vm4 = vcmask 1044484  }
   0x2   :  { %v2019_v1 = vld [vmem:[%s3200_s3] sm:$0xff]  ;;  %v2055_v12 = vld [vmem:[%s3203_s1 + $0x10] sm:$0x1f]  ;;  %v2077_v25 = vld [vmem:[%s3202_s0 + $0x18] sm:$0x1f]  ;;  %vm177_vm5 = vcmask 1045509  }
   0x3   :  { %v2024_v2 = vld [vmem:[%s3201_s6] sm:$0xff]  ;;  %v2089_v30 = vld [vmem:[%s3203_s1 + $0x8] sm:$0x1f]  ;;  %v2101_v42 = vld [vmem:[%s3203_s1 + $0x18] sm:$0x1f]  ;;  %vm179_vm6 = vcmask 1046534  }
   0x4   :  { %v2028_v3 = vmul.f32 %v2024_v2, %v2014_v0  ;;  %v52_v4 = vmul.f32 %v2024_v2, %v2019_v1  ;;  %v2035_v5 = vld [vmem:[%s3202_s0] sm:$0x1f]  ;;  %v2106_v43 = vld [vmem:[%s3202_s0 + $0x28] sm:$0x1f]  ;;  %v2131_v63 = vld [vmem:[%s3202_s0 + $0x30] sm:$0x1f] }
   0x5   :  { %v2040_v6 = vld [vmem:[%s3203_s1] sm:$0x1f]  ;;  %v2114_v49 = vld [vmem:[%s3203_s1 + $0x28] sm:$0x1f]  ;;  %vm181_vm7 = vcmask 1047559   ;;  %vm184_vm8 = vcmask 39936  }
   0x6   :  { %v2042_v7 = vsub.f32 0.0, %v52_v4  ;;  %v62_v8 = vperm.slane %v2028_v3, 0  ;;  %v56_v10 = vrot.slane %v2028_v3, 2  ;;  %v58_v11 = vrot.slane %v2028_v3, 4  ;;  %v2060_v13 = vld [vmem:[%s3202_s0 + $0x20] sm:$0x1f] }
   0x7   :  { %v55_v14 = vrot.slane %v2028_v3, 1  ;;  %v57_v15 = vrot.slane %v2028_v3, 3  ;;  %v2084_v29 = vld [vmem:[%s3203_s1 + $0x20] sm:$0x1f]  ;;  %v59_v44 = vrot.slane %v2028_v3, 5  ;;  %v60_v50 = vrot.slane %v2028_v3, 6 }
   0x8   :  { %v78_v16 = vmul.f32 %v62_v8, %v2035_v5  ;;  %v94_v17 = vperm.slane %v2042_v7, 0  ;;  %v64_v18 = vperm.slane %v56_v10, 0  ;;  %v88_v19 = vrot.slane %v2042_v7, 2  ;;  %v2123_v59 = vld [vmem:[%s3204_s7] sm:$0xff]  ;;  %v2136_v4 = vld [vmem:[%s3203_s1 + $0x30] sm:$0x1f] }
   0x9   :  { %v66_v21 = vperm.slane %v58_v11, 0  ;;  %v90_v22 = vrot.slane %v2042_v7, 4  ;;  %v63_v23 = vperm.slane %v55_v14, 0  ;;  %v87_v24 = vrot.slane %v2042_v7, 1 }
   0xa   :  { %v110_v26 = vmul.f32 %v94_v17, %v2040_v6  ;;  %v80_v27 = vmul.f32 %v64_v18, %v2048_v9  ;;  %v96_v28 = vperm.slane %v88_v19, 0  ;;  %v65_v31 = vperm.slane %v57_v15, 0  ;;  %v2142_v15 = vld [vmem:[%s3202_s0 + $0x38] sm:$0x1f] }
   0xb   :  { %v82_v32 = vmul.f32 %v66_v21, %v2060_v13  ;;  %v98_v33 = vperm.slane %v90_v22, 0  ;;  %v79_v34 = vmul.f32 %v63_v23, %v2070_v20  ;;  %v95_v35 = vperm.slane %v87_v24, 0  ;;  %v2159_v22 = vld [vmem:[%s3203_s1 + $0x38] sm:$0x1f] }
   0xc   :  { %v118_v36 = vadd.f32 %v110_v26, %v78_v16  ;;  %v112_v37 = vmul.f32 %v96_v28, %v2055_v12  ;;  %v81_v38 = vmul.f32 %v65_v31, %v2077_v25  ;;  %v89_v39 = vrot.slane %v2042_v7, 3 }
   0xd   :  { %v114_v40 = vmul.f32 %v98_v33, %v2084_v29  ;;  %v111_v41 = vmul.f32 %v95_v35, %v2089_v30  ;;  %v91_v45 = vrot.slane %v2042_v7, 5  ;;  %v67_v53 = vperm.slane %v59_v44, 0 }
   0xe   :  { %v127_v46 = vsel %vm126_vm0, %v118_v36, 0.0  ;;  %v120_v47 = vadd.f32 %v112_v37, %v80_v27  ;;  %v97_v48 = vperm.slane %v89_v39, 0  ;;  %v68_v57 = vperm.slane %v60_v50, 0 }
   0xf   :  { %128 = vadd.xlane.f32.xlu0 %v127_v46  ;;  %v122_v51 = vadd.f32 %v114_v40, %v82_v32  ;;  %v119_v52 = vadd.f32 %v111_v41, %v79_v34  ;;  %v99_v54 = vperm.slane %v91_v45, 0  ;;  %v92_v58 = vrot.slane %v2042_v7, 6 }
  0x10   :  { %v133_v55 = vsel %vm126_vm0, %v120_v47, 0.0  ;;  %v113_v56 = vmul.f32 %v97_v48, %v2101_v42  ;;  %v83_v61 = vmul.f32 %v67_v53, %v2106_v43  ;;  %v61_v11 = vrot.slane %v2028_v3, 7 }
  0x11   :  { %134 = vadd.xlane.f32.xlu1 %v133_v55  ;;  %v139_v60 = vsel %vm126_vm0, %v122_v51, 0.0  ;;  %v115_v62 = vmul.f32 %v99_v54, %v2114_v49  ;;  %v100_v10 = vperm.slane %v92_v58, 0  ;;  %v93_v16 = vrot.slane %v2042_v7, 7 }
  0x12   :  { %140 = vadd.xlane.f32.xlu2 %v139_v60  ;;  %v121_v8 = vadd.f32 %v113_v56, %v81_v38  ;;  %v2147_v17 = vmul.f32 %v2123_v59, %v2019_v1  ;;  %v2151_v18 = vmul.f32 %v2123_v59, %v2014_v0  ;;  %v130_v19 = vsel %vm126_vm0, %v119_v52, 0.0 }
  0x13   :  { %v123_v14 = vadd.f32 %v115_v62, %v83_v61  ;;  %v84_v3 = vmul.f32 %v68_v57, %v2131_v63  ;;  %v116_v21 = vmul.f32 %v100_v10, %v2136_v4  ;;  %v69_v7 = vperm.slane %v61_v11, 0 }
  0x14   :  { %v136_v23 = vsel %vm126_vm0, %v121_v8, 0.0  ;;  %v101_v1 = vperm.slane %v93_v16, 0  ;;  %v316_v24 = vperm.slane %v2147_v17, 0  ;;  %v348_v26 = vperm.slane %v2151_v18, 0 }
  0x15   :  { %v85_v0 = vmul.f32 %v69_v7, %v2142_v15  ;;  %v309_v27 = vrot.slane %v2147_v17, 1  ;;  %v341_v28 = vrot.slane %v2151_v18, 1  ;;  %v142_v31 = vsel %vm126_vm0, %v123_v14, 0.0 }
  0x16   :  { %v117_v32 = vmul.f32 %v101_v1, %v2159_v22  ;;  %v310_v33 = vrot.slane %v2147_v17, 2  ;;  %v124_v34 = vadd.f32 %v116_v21, %v84_v3  ;;  %v342_v37 = vrot.slane %v2151_v18, 2 }
  0x17   :  { %131 = vadd.xlane.f32.xlu0 %v130_v19  ;;  %v317_v35 = vperm.slane %v309_v27, 0  ;;  %v349_v36 = vperm.slane %v341_v28, 0  ;;  %v332_v40 = vmul.f32 %v316_v24, %v2035_v5  ;;  %v364_v41 = vmul.f32 %v348_v26, %v2040_v6  ;;  %v2190_v19 = vld [vmem:[%s3205_s4] sm:$0xff] }
  0x18   :  { %v318_v38 = vperm.slane %v310_v33, 0  ;;  %v125_v39 = vadd.f32 %v117_v32, %v85_v0  ;;  %v350_v44 = vperm.slane %v342_v37, 0  ;;  %v145_v48 = vsel %vm126_vm0, %v124_v34, 0.0 }
  0x19   :  { %137 = vadd.xlane.f32.xlu1 %v136_v23  ;;  %v333_v45 = vmul.f32 %v317_v35, %v2070_v20  ;;  %v365_v46 = vmul.f32 %v349_v36, %v2089_v30  ;;  %v311_v51 = vrot.slane %v2147_v17, 3  ;;  %v312_v52 = vrot.slane %v2147_v17, 4  ;;  %v2196_v23 = vld [vmem:[%s3206_s5] sm:$0xff] }
  0x1a   :  { %143 = vadd.xlane.f32.xlu2 %v142_v31  ;;  %v334_v47 = vmul.f32 %v318_v38, %v2048_v9  ;;  %v366_v50 = vmul.f32 %v350_v44, %v2055_v12  ;;  %v343_v53 = vrot.slane %v2151_v18, 3  ;;  %v344_v54 = vrot.slane %v2151_v18, 4 }
  0x1b   :  { %v313_v55 = vrot.slane %v2147_v17, 5  ;;  %v345_v56 = vrot.slane %v2151_v18, 5  ;;  %v148_v57 = vsel %vm126_vm0, %v125_v39, 0.0  ;;  %v372_v58 = vadd.f32 %v364_v41, %v332_v40 }
  0x1c   :  { %v374_v60 = vadd.f32 %v366_v50, %v334_v47  ;;  %v320_v61 = vperm.slane %v312_v52, 0  ;;  %v373_v62 = vadd.f32 %v365_v46, %v333_v45  ;;  %v352_v8 = vperm.slane %v344_v54, 0 }
  0x1d   :  { %v321_v10 = vperm.slane %v313_v55, 0  ;;  %v353_v16 = vperm.slane %v345_v56, 0  ;;  %v319_v3 = vperm.slane %v311_v51, 0  ;;  %v351_v21 = vperm.slane %v343_v53, 0 }
  0x1e   :  { %v386_v11 = vsel %vm126_vm0, %v374_v60, 0.0  ;;  %v336_v14 = vmul.f32 %v320_v61, %v2060_v13  ;;  %v368_v7 = vmul.f32 %v352_v8, %v2084_v29  ;;  %v380_v1 = vsel %vm126_vm0, %v372_v58, 0.0 }
  0x1f   :  { %146 = vadd.xlane.f32.xlu0 %v145_v48  ;;  %v315_v24 = vrot.slane %v2147_v17, 7  ;;  %v347_v0 = vrot.slane %v2151_v18, 7  ;;  %v383_v26 = vsel %vm126_vm0, %v373_v62, 0.0  ;;  %v337_v28 = vmul.f32 %v321_v10, %v2106_v43 }
  0x20   :  { %v376_v27 = vadd.f32 %v368_v7, %v336_v14  ;;  %v2205_v31 = vmul.f32 %v2024_v2, %v2190_v19  ;;  %v369_v32 = vmul.f32 %v353_v16, %v2114_v49  ;;  %v550_v35 = vmul.f32 %v2024_v2, %v2196_v23 }
  0x21   :  { %149 = vadd.xlane.f32.xlu1 %v148_v57  ;;  %v323_v33 = vperm.slane %v315_v24, 0  ;;  %v355_v34 = vperm.slane %v347_v0, 0  ;;  %v335_v36 = vmul.f32 %v319_v3, %v2077_v25  ;;  %v367_v37 = vmul.f32 %v351_v21, %v2101_v42 }
  0x22   :  { %387 = vadd.xlane.f32.xlu2 %v386_v11  ;;  %v314_v38 = vrot.slane %v2147_v17, 6  ;;  %v553_v39 = vrot.slane %v2205_v31, 1  ;;  %v346_v40 = vrot.slane %v2151_v18, 6  ;;  %v2217_v45 = vsub.f32 0.0, %v550_v35 }
  0x23   :  { %v339_v41 = vmul.f32 %v323_v33, %v2142_v15  ;;  %v371_v44 = vmul.f32 %v355_v34, %v2159_v22  ;;  %v392_v46 = vsel %vm126_vm0, %v376_v27, 0.0  ;;  %v554_v2 = vrot.slane %v2205_v31, 2 }
  0x24   :  { %v377_v47 = vadd.f32 %v369_v32, %v337_v28  ;;  %v561_v48 = vperm.slane %v553_v39, 0  ;;  %v585_v50 = vrot.slane %v2217_v45, 1  ;;  %v375_v17 = vadd.f32 %v367_v37, %v335_v36 }
  0x25   :  { %v322_v51 = vperm.slane %v314_v38, 0  ;;  %v586_v18 = vrot.slane %v2217_v45, 2  ;;  %v354_v52 = vperm.slane %v346_v40, 0  ;;  %v379_v53 = vadd.f32 %v371_v44, %v339_v41 }
  0x26   :  { %v593_v54 = vperm.slane %v585_v50, 0  ;;  %v562_v55 = vperm.slane %v554_v2, 0  ;;  %v556_v57 = vrot.slane %v2205_v31, 4  ;;  %v395_v58 = vsel %vm126_vm0, %v377_v47, 0.0 }
  0x27   :  { %384 = vadd.xlane.f32.xlu0 %v383_v26  ;;  %v594_v56 = vperm.slane %v586_v18, 0  ;;  %v577_v60 = vmul.f32 %v561_v48, %v2070_v20  ;;  %v588_v62 = vrot.slane %v2217_v45, 4  ;;  %v389_v8 = vsel %vm126_vm0, %v375_v17, 0.0 }
  0x28   :  { %v609_v61 = vmul.f32 %v593_v54, %v2089_v30  ;;  %v338_v10 = vmul.f32 %v322_v51, %v2131_v63  ;;  %v370_v11 = vmul.f32 %v354_v52, %v2136_v4  ;;  %v401_v14 = vsel %vm126_vm0, %v379_v53, 0.0 }
  0x29   :  { %381 = vadd.xlane.f32.xlu1 %v380_v1  ;;  %v578_v16 = vmul.f32 %v562_v55, %v2048_v9  ;;  %v610_v3 = vmul.f32 %v594_v56, %v2055_v12  ;;  %v564_v21 = vperm.slane %v556_v57, 0  ;;  %v557_v7 = vrot.slane %v2205_v31, 5 }
  0x2a   :  { %393 = vadd.xlane.f32.xlu2 %v392_v46  ;;  %v589_v1 = vrot.slane %v2217_v45, 5  ;;  %v617_v24 = vadd.f32 %v609_v61, %v577_v60  ;;  %v596_v0 = vperm.slane %v588_v62, 0  ;;  %v378_v26 = vadd.f32 %v370_v11, %v338_v10 }
  0x2b   :  { %v560_v27 = vperm.slane %v2205_v31, 0  ;;  %v592_v28 = vperm.slane %v2217_v45, 0  ;;  %v618_v32 = vadd.f32 %v610_v3, %v578_v16  ;;  %v580_v33 = vmul.f32 %v564_v21, %v2060_v13 }
  0x2c   :  { %v565_v34 = vperm.slane %v557_v7, 0  ;;  %v597_v35 = vperm.slane %v589_v1, 0  ;;  %v627_v36 = vsel %vm126_vm0, %v617_v24, 0.0  ;;  %v612_v37 = vmul.f32 %v596_v0, %v2084_v29 }
  0x2d   :  { %v559_v38 = vrot.slane %v2205_v31, 7  ;;  %v591_v39 = vrot.slane %v2217_v45, 7  ;;  %v555_v40 = vrot.slane %v2205_v31, 3  ;;  %v398_v41 = vsel %vm126_vm0, %v378_v26, 0.0 }
  0x2e   :  { %v576_v44 = vmul.f32 %v560_v27, %v2035_v5  ;;  %v608_v46 = vmul.f32 %v592_v28, %v2040_v6  ;;  %v587_v2 = vrot.slane %v2217_v45, 3  ;;  %v630_v47 = vsel %vm126_vm0, %v618_v32, 0.0 }
  0x2f   :  { %396 = vadd.xlane.f32.xlu0 %v395_v58  ;;  %v581_v48 = vmul.f32 %v565_v34, %v2106_v43  ;;  %v613_v50 = vmul.f32 %v597_v35, %v2114_v49  ;;  %v620_v17 = vadd.f32 %v612_v37, %v580_v33  ;;  %v567_v51 = vperm.slane %v559_v38, 0 }
  0x30   :  { %v599_v18 = vperm.slane %v591_v39, 0  ;;  %v563_v52 = vperm.slane %v555_v40, 0  ;;  %v616_v53 = vadd.f32 %v608_v46, %v576_v44  ;;  %v595_v54 = vperm.slane %v587_v2, 0 }
  0x31   :  { %390 = vadd.xlane.f32.xlu1 %v389_v8  ;;  %v621_v55 = vadd.f32 %v613_v50, %v581_v48  ;;  %v636_v56 = vsel %vm126_vm0, %v620_v17, 0.0  ;;  %v583_v57 = vmul.f32 %v567_v51, %v2142_v15  ;;  %v558_v8 = vrot.slane %v2205_v31, 6 }
  0x32   :  { %402 = vadd.xlane.f32.xlu2 %v401_v14  ;;  %v615_v58 = vmul.f32 %v599_v18, %v2159_v22  ;;  %v579_v60 = vmul.f32 %v563_v52, %v2077_v25  ;;  %v624_v61 = vsel %vm126_vm0, %v616_v53, 0.0  ;;  %v611_v62 = vmul.f32 %v595_v54, %v2101_v42 }
  0x33   :  { %v590_v10 = vrot.slane %v2217_v45, 6  ;;  %v639_v11 = vsel %vm126_vm0, %v621_v55, 0.0  ;;  %v566_v3 = vperm.slane %v558_v8, 0  ;;  %v2267_v26 = vmul.f32 %v2123_v59, %v2196_v23 }
  0x34   :  { %v623_v14 = vadd.f32 %v615_v58, %v583_v57  ;;  %v619_v16 = vadd.f32 %v611_v62, %v579_v60  ;;  %v2271_v27 = vmul.f32 %v2123_v59, %v2190_v19  ;;  %vm1859_vm9 = vcmask 7168  }
  0x35   :  { %v598_v21 = vperm.slane %v590_v10, 0  ;;  %v582_v24 = vmul.f32 %v566_v3, %v2131_v63  ;;  %v797_v28 = vrot.slane %v2267_v26, 2  ;;  %v800_v23 = vrot.slane %v2267_v26, 5 }
  0x36   :  { %v645_v7 = vsel %vm126_vm0, %v623_v14, 0.0  ;;  %v633_v1 = vsel %vm126_vm0, %v619_v16, 0.0  ;;  %v829_v32 = vrot.slane %v2271_v27, 2  ;;  %v832_v39 = vrot.slane %v2271_v27, 5 }
  0x37   :  { %628 = vadd.xlane.f32.xlu0 %v627_v36  ;;  %v614_v0 = vmul.f32 %v598_v21, %v2136_v4  ;;  %v805_v33 = vperm.slane %v797_v28, 0  ;;  %v808_v59 = vperm.slane %v800_v23, 0  ;;  %v796_v60 = vrot.slane %v2267_v26, 1 }
  0x38   :  { %v837_v34 = vperm.slane %v829_v32, 0  ;;  %v840_v19 = vperm.slane %v832_v39, 0  ;;  %v799_v32 = vrot.slane %v2267_v26, 4 }
  0x39   :  { %399 = vadd.xlane.f32.xlu1 %v398_v41  ;;  %v622_v31 = vadd.f32 %v614_v0, %v582_v24  ;;  %v821_v35 = vmul.f32 %v805_v33, %v2048_v9  ;;  %v824_v40 = vmul.f32 %v808_v59, %v2106_v43  ;;  %v804_v10 = vperm.slane %v796_v60, 0 }
  0x3a   :  { %631 = vadd.xlane.f32.xlu2 %v630_v47  ;;  %v853_v36 = vmul.f32 %v837_v34, %v2055_v12  ;;  %v856_v41 = vmul.f32 %v840_v19, %v2114_v49  ;;  %v159_v12 = vlaneseq  ;;  %v831_v33 = vrot.slane %v2271_v27, 4 }
  0x3b   :  { %v642_v45 = vsel %vm126_vm0, %v622_v31, 0.0  ;;  %v803_v60 = vperm.slane %v2267_v26, 0 }
  0x3c   :  { %v861_v37 = vadd.f32 %v853_v36, %v821_v35  ;;  %v864_v44 = vadd.f32 %v856_v41, %v824_v40  ;;  %v2289_v48 = vand.u32 127, %v159_v12  ;;  %v807_v35 = vperm.slane %v799_v32, 0 }
  0x3d   :  { %v839_v36 = vperm.slane %v831_v33, 0  ;;  %v802_v40 = vrot.slane %v2267_v26, 7  ;;  %v834_v41 = vrot.slane %v2271_v27, 7 }
  0x3e   :  { %v873_v38 = vsel %vm126_vm0, %v861_v37, 0.0  ;;  %v882_v46 = vsel %vm126_vm0, %v864_v44, 0.0 }
  0x3f   :  { %637 = vadd.xlane.f32.xlu0 %v636_v56  ;;  %v855_v37 = vmul.f32 %v839_v36, %v2084_v29  ;;  %v842_v12 = vperm.slane %v834_v41, 0 }
  0x41   :  { %625 = vadd.xlane.f32.xlu1 %v624_v61  ;;  %v828_v61 = vrot.slane %v2271_v27, 1 }
  0x42   :  { %640 = vadd.xlane.f32.xlu2 %v639_v11 }
  0x43   :  { %v836_v11 = vperm.slane %v828_v61, 0  ;;  %v835_v61 = vperm.slane %v2271_v27, 0 }
  0x45   :  { %v852_v24 = vmul.f32 %v836_v11, %v2089_v30  ;;  %v823_v30 = vmul.f32 %v807_v35, %v2060_v13 }
  0x47   :  { %646 = vadd.xlane.f32.xlu0 %v645_v7  ;;  %v863_v59 = vadd.f32 %v855_v37, %v823_v30 }
  0x49   :  { %634 = vadd.xlane.f32.xlu1 %v633_v1  ;;  %v820_v1 = vmul.f32 %v804_v10, %v2070_v20  ;;  %v879_v19 = vsel %vm126_vm0, %v863_v59, 0.0 }
  0x4a   :  { %874 = vadd.xlane.f32.xlu2 %v873_v38 }
  0x4b   :  { %v860_v31 = vadd.f32 %v852_v24, %v820_v1  ;;  %v851_v1 = vmul.f32 %v835_v61, %v2040_v6 }
  0x4d   :  { %v870_v28 = vsel %vm126_vm0, %v860_v31, 0.0  ;;  %v830_v31 = vrot.slane %v2271_v27, 3 }
  0x4f   :  { %v838_v36 = vperm.slane %v830_v31, 0 }
  0x51   :  { %643 = vadd.xlane.f32.xlu1 %v642_v45  ;;  %v854_v59 = vmul.f32 %v838_v36, %v2101_v42 }
  0x52   :  { %883 = vadd.xlane.f32.xlu2 %v882_v46  ;;  %v810_v46 = vperm.slane %v802_v40, 0  ;;  %v833_v40 = vrot.slane %v2271_v27, 6 }
  0x59   :  { %871 = vadd.xlane.f32.xlu1 %v870_v28 }
  0x61   :  { %880 = vadd.xlane.f32.xlu1 %v879_v19  ;;  %v801_v19 = vrot.slane %v2267_v26, 6 }
  0x82   :  { %v2283_v9 = vpop.xlane.xlu0 %128 }
  0x83   :  { %v161_v50 = vperm.slane %v2283_v9, %v2289_v48 }
  0x84   :  { %v2285_v2 = vpop.xlane.xlu1 %134 }
  0x85   :  { %v2287_v47 = vpop.xlane.xlu2 %140  ;;  %v163_v17 = vperm.slane %v2285_v2, %v2289_v48 }
  0x86   :  { %v165_v18 = vperm.slane %v2287_v47, %v2289_v48 }
  0x8a   :  { %v2293_v43 = vpop.xlane.xlu0 %131 }
  0x8b   :  { %v162_v49 = vperm.slane %v2293_v43, %v2289_v48 }
  0x8c   :  { %v2299_v51 = vpop.xlane.xlu1 %137 }
  0x8d   :  { %v170_v52 = vsel %vm169_vm1, %v162_v49, %v161_v50  ;;  %v164_v53 = vperm.slane %v2299_v51, %v2289_v48  ;;  %v2306_v54 = vpop.xlane.xlu2 %143 }
  0x8e   :  { %v172_v55 = vsel %vm171_vm2, %v163_v17, %v170_v52  ;;  %v166_v57 = vperm.slane %v2306_v54, %v2289_v48  ;;  %v826_v17 = vmul.f32 %v810_v46, %v2142_v15  ;;  %v809_v46 = vperm.slane %v801_v19, 0 }
  0x8f   :  { %v174_v56 = vsel %vm173_vm3, %v164_v53, %v172_v55 }
  0x90   :  { %v176_v58 = vsel %vm175_vm4, %v165_v18, %v174_v56  ;;  %v858_v18 = vmul.f32 %v842_v12, %v2159_v22  ;;  %v841_v12 = vperm.slane %v833_v40, 0 }
  0x91   :  { %v178_v16 = vsel %vm177_vm5, %v166_v57, %v176_v58 }
  0x92   :  { %v2315_v62 = vpop.xlane.xlu0 %146  ;;  %v866_v56 = vadd.f32 %v858_v18, %v826_v17 }
  0x93   :  { %v167_v8 = vperm.slane %v2315_v62, %v2289_v48 }
  0x94   :  { %v2319_v14 = vpop.xlane.xlu1 %149  ;;  %v888_v15 = vsel %vm126_vm0, %v866_v56, 0.0 }
  0x95   :  { %v168_v3 = vperm.slane %v2319_v14, %v2289_v48  ;;  %v180_v21 = vsel %vm179_vm6, %v167_v8, %v178_v16  ;;  %v2325_v7 = vpop.xlane.xlu2 %387  ;;  %889 = vadd.xlane.f32.xlu1 %v888_v15 }
  0x96   :  { %v414_v13 = vperm.slane %v2325_v7, %v2289_v48 }
  0x97   :  { %v182_v0 = vsel %vm181_vm7, %v168_v3, %v180_v21  ;;  %v819_v21 = vmul.f32 %v803_v60, %v2035_v5 }
  0x98   :  { %v185_v45 = vsel %vm184_vm8, %v182_v0, -inf  ;;  %v798_v0 = vrot.slane %v2267_v26, 3 }
  0x99   :  { %186 = vmax.xlane.f32.xlu2 %v185_v45  ;;  %v859_v32 = vadd.f32 %v851_v1, %v819_v21  ;;  %v1965_v21 = vmov 0  }
  0x9a   :  { %v2336_v20 = vpop.xlane.xlu0 %384  ;;  %v806_v35 = vperm.slane %v798_v0, 0  ;;  %1867 = vset.pattern.permute.xlu1 %v1965_v21  ;;  %1866 = vset.pattern.permute.xlu0 %v1965_v21 }
  0x9b   :  { %v413_v39 = vperm.slane %v2336_v20, %v2289_v48  ;;  %v867_v37 = vsel %vm126_vm0, %v859_v32, 0.0  ;;  %1868 = vset.pattern.permute.xlu2 %v1965_v21 }
  0x9c   :  { %v2334_v34 = vpop.xlane.xlu1 %381 }
  0x9d   :  { %v2340_v38 = vpop.xlane.xlu2 %393  ;;  %v412_v23 = vperm.slane %v2334_v34, %v2289_v48 }
  0x9e   :  { %v416_v53 = vperm.slane %v2340_v38, %v2289_v48 }
  0x9f   :  { %v420_v29 = vsel %vm169_vm1, %v413_v39, %v412_v23  ;;  %v822_v39 = vmul.f32 %v806_v35, %v2077_v25 }
  0xa0   :  { %v421_v52 = vsel %vm171_vm2, %v414_v13, %v420_v29 }
  0xa1   :  { %v862_v29 = vadd.f32 %v854_v59, %v822_v39 }
  0xa2   :  { %v2356_v49 = vpop.xlane.xlu0 %396 }
  0xa3   :  { %v417_v58 = vperm.slane %v2356_v49, %v2289_v48  ;;  %v876_v18 = vsel %vm126_vm0, %v862_v29, 0.0 }
  0xa4   :  { %v2352_v44 = vpop.xlane.xlu1 %390 }
  0xa5   :  { %v415_v50 = vperm.slane %v2352_v44, %v2289_v48  ;;  %v2364_v57 = vpop.xlane.xlu2 %402 }
  0xa6   :  { %v419_v10 = vperm.slane %v2364_v57, %v2289_v48 }
  0xa7   :  { %v422_v55 = vsel %vm173_vm3, %v415_v50, %v421_v52  ;;  %v825_v52 = vmul.f32 %v809_v46, %v2131_v63 }
  0xa8   :  { %v423_v22 = vsel %vm175_vm4, %v416_v53, %v422_v55  ;;  %v857_v53 = vmul.f32 %v841_v12, %v2136_v4 }
  0xa9   :  { %v424_v3 = vsel %vm177_vm5, %v417_v58, %v423_v22 }
  0xaa   :  { %v2378_v16 = vpop.xlane.xlu0 %628  ;;  %v865_v60 = vadd.f32 %v857_v53, %v825_v52 }
  0xab   :  { %v657_v6 = vperm.slane %v2378_v16, %v2289_v48 }
  0xac   :  { %v2372_v8 = vpop.xlane.xlu1 %399  ;;  %v885_v4 = vsel %vm126_vm0, %v865_v60, 0.0 }
  0xad   :  { %v418_v11 = vperm.slane %v2372_v8, %v2289_v48  ;;  %v2388_v33 = vpop.xlane.xlu2 %631 }
  0xae   :  { %v658_v41 = vperm.slane %v2388_v33, %v2289_v48 }
  0xaf   :  { %v425_v24 = vsel %vm179_vm6, %v418_v11, %v424_v3 }
  0xb0   :  { %v426_v45 = vsel %vm181_vm7, %v419_v10, %v425_v24 }
  0xb1   :  { %v428_v28 = vsel %vm184_vm8, %v426_v45, -inf }
  0xb2   :  { %429 = vmax.xlane.f32.xlu0 %v428_v28  ;;  %v2397_v23 = vpop.xlane.xlu0 %637 }
  0xb3   :  { %v660_v42 = vperm.slane %v2397_v23, %v2289_v48 }
  0xb4   :  { %v2390_v30 = vpop.xlane.xlu1 %625 }
  0xb5   :  { %v656_v5 = vperm.slane %v2390_v30, %v2289_v48  ;;  %v2413_v26 = vpop.xlane.xlu2 %640 }
  0xb6   :  { %v661_v55 = vperm.slane %v2413_v26, %v2289_v48 }
  0xb7   :  { %v664_v13 = vsel %vm169_vm1, %v657_v6, %v656_v5 }
  0xb8   :  { %v665_v50 = vsel %vm171_vm2, %v658_v41, %v664_v13 }
  0xba   :  { %868 = vadd.xlane.f32.xlu0 %v867_v37  ;;  %v2422_v58 = vpop.xlane.xlu0 %646 }
  0xbb   :  { %v663_v15 = vperm.slane %v2422_v58, %v2289_v48 }
  0xbc   :  { %v2407_v17 = vpop.xlane.xlu1 %634 }
  0xbd   :  { %v659_v25 = vperm.slane %v2407_v17, %v2289_v48  ;;  %v2435_v1 = vpop.xlane.xlu2 %874 }
  0xbf   :  { %v666_v27 = vsel %vm173_vm3, %v659_v25, %v665_v50 }
  0xc0   :  { %v667_v56 = vsel %vm175_vm4, %v660_v42, %v666_v27 }
  0xc1   :  { %v668_v22 = vsel %vm177_vm5, %v661_v55, %v667_v56 }
  0xc2   :  { %877 = vadd.xlane.f32.xlu0 %v876_v18 }
  0xc4   :  { %v2424_v61 = vpop.xlane.xlu1 %643 }
  0xc5   :  { %v662_v63 = vperm.slane %v2424_v61, %v2289_v48  ;;  %v2437_v24 = vpop.xlane.xlu2 %883 }
  0xc7   :  { %v669_v10 = vsel %vm179_vm6, %v662_v63, %v668_v22 }
  0xc8   :  { %v670_v11 = vsel %vm181_vm7, %v663_v15, %v669_v10 }
  0xc9   :  { %v672_v3 = vsel %vm184_vm8, %v670_v11, -inf }
  0xca   :  { %886 = vadd.xlane.f32.xlu0 %v885_v4  ;;  %673 = vmax.xlane.f32.xlu2 %v672_v3 }
  0xcc   :  { %v2455_v19 = vpop.xlane.xlu1 %871 }
  0xcd   :  { %v900_v52 = vperm.slane %v2455_v19, %v2289_v48 }
  0xd4   :  { %v2470_v27 = vpop.xlane.xlu1 %880 }
  0xd5   :  { %v903_v21 = vperm.slane %v2470_v27, %v2289_v48 }
 0x10c   :  { %v2439_v0 = vpop.xlane.xlu2 %186 }
 0x10d   :  { %v190_v31 = vperm.slane %v2439_v0, 1  ;;  %v193_v28 = vperm.slane %v2439_v0, 4  ;;  %v195_v5 = vperm.slane %v2439_v0, 6  ;;  %v189_v18 = vperm.slane %v2439_v0, 0 }
 0x10e   :  { %v196_v11 = vperm.slane %v2439_v0, 7 }
 0x10f   :  { %v206_v45 = vsub.f32 %v2293_v43, %v190_v31  ;;  %v209_v35 = vsub.f32 %v2287_v47, %v193_v28  ;;  %v211_v37 = vsub.f32 %v2315_v62, %v195_v5  ;;  %v205_v15 = vsub.f32 %v2283_v9, %v189_v18 }
 0x111   :  { %v215_v32 = vmul.f32 1.442695, %v206_v45  ;;  %v221_v36 = vmul.f32 1.442695, %v209_v35  ;;  %v225_v39 = vmul.f32 1.442695, %v211_v37 }
 0x112   :  { %v213_v31 = vmul.f32 1.442695, %v205_v15 }
 0x113   :  { %1869 = vpow2.f32 %v215_v32  ;;  %v2500_v32 = vpop.xlane.xlu1 %889 }
 0x114   :  { %1871 = vpow2.f32 %v221_v36  ;;  %v212_v36 = vsub.f32 %v2319_v14, %v196_v11 }
 0x115   :  { %1873 = vpow2.f32 %v225_v39 }
 0x119   :  { %v2446_v6 = vpop.eup %1869 }
 0x11a   :  { %241 = vperm.xlu1 %1867, %v2446_v6   ;;  %v2450_v59 = vpop.eup %1871 }
 0x11b   :  { %v2462_v29 = vpop.eup %1873 }
 0x122   :  { %250 = vperm.xlu1 %1867, %v2450_v59  }
 0x125   :  { %v2453_v43 = vpop.xlane.xlu0 %429 }
 0x126   :  { %v434_v47 = vperm.slane %v2453_v43, 2  ;;  %v432_v40 = vperm.slane %v2453_v43, 0  ;;  %v436_v62 = vperm.slane %v2453_v43, 4  ;;  %v435_v46 = vperm.slane %v2453_v43, 3 }
 0x127   :  { %v438_v56 = vperm.slane %v2453_v43, 6 }
 0x128   :  { %v450_v41 = vsub.f32 %v2325_v7, %v434_v47  ;;  %v448_v13 = vsub.f32 %v2334_v34, %v432_v40  ;;  %v452_v25 = vsub.f32 %v2340_v38, %v436_v62  ;;  %v451_v7 = vsub.f32 %v2352_v44, %v435_v46 }
 0x129   :  { %v901_v44 = vperm.slane %v2435_v1, %v2289_v48  ;;  %v454_v4 = vsub.f32 %v2372_v8, %v438_v56  ;;  %v904_v8 = vperm.slane %v2437_v24, %v2289_v48  ;;  %v906_v47 = vperm.slane %v2500_v32, %v2289_v48 }
 0x12a   :  { %256 = vperm.xlu1 %1867, %v2462_v29   ;;  %v460_v12 = vmul.f32 1.442695, %v450_v41  ;;  %v456_v50 = vmul.f32 1.442695, %v448_v13  ;;  %v464_v34 = vmul.f32 1.442695, %v452_v25 }
 0x12b   :  { %v462_v55 = vmul.f32 1.442695, %v451_v7  ;;  %v468_v45 = vmul.f32 1.442695, %v454_v4  ;;  %v227_v13 = vmul.f32 1.442695, %v212_v36 }
 0x12c   :  { %1875 = vpow2.f32 %v460_v12  ;;  %v439_v12 = vperm.slane %v2453_v43, 7 }
 0x12d   :  { %v2467_v42 = vpop.xlane.xlu0 %868  ;;  %1877 = vpow2.f32 %v456_v50 }
 0x12e   :  { %v899_v53 = vperm.slane %v2467_v42, %v2289_v48  ;;  %1879 = vpow2.f32 %v464_v34 }
 0x12f   :  { %1881 = vpow2.f32 %v462_v55  ;;  %v191_v55 = vperm.slane %v2439_v0, 2 }
 0x130   :  { %v907_v22 = vsel %vm169_vm1, %v900_v52, %v899_v53  ;;  %1883 = vpow2.f32 %v213_v31 }
 0x131   :  { %v908_v3 = vsel %vm171_vm2, %v901_v44, %v907_v22  ;;  %1885 = vpow2.f32 %v468_v45  ;;  %v207_v11 = vsub.f32 %v2285_v2, %v191_v55 }
 0x132   :  { %v2478_v38 = vpop.eup %1875  ;;  %1887 = vpow2.f32 %v227_v13 }
 0x133   :  { %v2480_v60 = vpop.eup %1877  ;;  %487 = vperm.xlu0 %1866, %v2478_v38  }
 0x134   :  { %481 = vperm.xlu1 %1867, %v2480_v60   ;;  %v2498_v28 = vpop.eup %1879 }
 0x135   :  { %v2488_v63 = vpop.xlane.xlu0 %877  ;;  %v2502_v35 = vpop.eup %1881 }
 0x136   :  { %v902_v10 = vperm.slane %v2488_v63, %v2289_v48  ;;  %v2525_v7 = vpop.eup %1883 }
 0x137   :  { %v2528_v52 = vpop.eup %1885 }
 0x138   :  { %v909_v9 = vsel %vm173_vm3, %v902_v10, %v908_v3  ;;  %v2536_v15 = vpop.eup %1887  ;;  %v217_v3 = vmul.f32 1.442695, %v207_v11 }
 0x139   :  { %v910_v5 = vsel %vm175_vm4, %v903_v21, %v909_v9  ;;  %v192_v21 = vperm.slane %v2439_v0, 3 }
 0x13a   :  { %v911_v14 = vsel %vm177_vm5, %v904_v8, %v910_v5  ;;  %v194_v5 = vperm.slane %v2439_v0, 5 }
 0x13b   :  { %493 = vperm.xlu0 %1866, %v2498_v28   ;;  %v208_v2 = vsub.f32 %v2299_v51, %v192_v21 }
 0x13c   :  { %490 = vperm.xlu1 %1867, %v2502_v35   ;;  %v210_v51 = vsub.f32 %v2306_v54, %v194_v5 }
 0x13d   :  { %v2510_v37 = vpop.xlane.xlu2 %673  ;;  %v2512_v39 = vpop.xlane.xlu0 %886 }
 0x13e   :  { %v905_v40 = vperm.slane %v2512_v39, %v2289_v48  ;;  %v676_v41 = vperm.slane %v2510_v37, 0  ;;  %v680_v25 = vperm.slane %v2510_v37, 4  ;;  %v677_v44 = vperm.slane %v2510_v37, 1 }
 0x13f   :  { %v683_v4 = vperm.slane %v2510_v37, 7  ;;  %v679_v9 = vperm.slane %v2510_v37, 3  ;;  %v223_v0 = vmul.f32 1.442695, %v210_v51  ;;  %v678_v55 = vperm.slane %v2510_v37, 2 }
 0x140   :  { %v912_v62 = vsel %vm179_vm6, %v905_v40, %v911_v14  ;;  %v692_v46 = vsub.f32 %v2390_v30, %v676_v41  ;;  %v455_v30 = vsub.f32 %v2364_v57, %v439_v12  ;;  %v696_v53 = vsub.f32 %v2397_v23, %v680_v25 }
 0x141   :  { %v913_v50 = vsel %vm181_vm7, %v906_v47, %v912_v62  ;;  %v693_v57 = vsub.f32 %v2378_v16, %v677_v44  ;;  %v699_v23 = vsub.f32 %v2422_v58, %v683_v4  ;;  %v695_v16 = vsub.f32 %v2407_v17, %v679_v9 }
 0x142   :  { %v915_v34 = vsel %vm184_vm8, %v913_v50, -inf  ;;  %v700_v18 = vmul.f32 1.442695, %v692_v46  ;;  %v470_v56 = vmul.f32 1.442695, %v455_v30  ;;  %v682_v40 = vperm.slane %v2510_v37, 6 }
 0x143   :  { %238 = vperm.xlu0 %1866, %v2525_v7   ;;  %916 = vmax.xlane.f32.xlu2 %v915_v34  ;;  %v708_v22 = vmul.f32 1.442695, %v696_v53  ;;  %v702_v31 = vmul.f32 1.442695, %v693_v57  ;;  %v714_v45 = vmul.f32 1.442695, %v699_v23 }
 0x144   :  { %499 = vperm.xlu1 %1867, %v2528_v52   ;;  %1889 = vpow2.f32 %v700_v18  ;;  %v219_v58 = vmul.f32 1.442695, %v208_v2  ;;  %v706_v47 = vmul.f32 1.442695, %v695_v16  ;;  %v698_v17 = vsub.f32 %v2424_v61, %v682_v40 }
 0x145   :  { %1891 = vpow2.f32 %v470_v56  ;;  %v433_v46 = vperm.slane %v2453_v43, 1  ;;  %v437_v34 = vperm.slane %v2453_v43, 5  ;;  %v681_v44 = vperm.slane %v2510_v37, 5 }
 0x146   :  { %1893 = vpow2.f32 %v708_v22  ;;  %v712_v62 = vmul.f32 1.442695, %v698_v17 }
 0x147   :  { %1895 = vpow2.f32 %v217_v3  ;;  %v449_v54 = vsub.f32 %v2336_v20, %v433_v46  ;;  %v453_v30 = vsub.f32 %v2356_v49, %v437_v34  ;;  %v694_v20 = vsub.f32 %v2388_v33, %v678_v55 }
 0x148   :  { %1897 = vpow2.f32 %v702_v31  ;;  %v697_v49 = vsub.f32 %v2413_v26, %v681_v44 }
 0x149   :  { %1899 = vpow2.f32 %v714_v45  ;;  %v458_v25 = vmul.f32 1.442695, %v449_v54  ;;  %v466_v53 = vmul.f32 1.442695, %v453_v30  ;;  %v704_v43 = vmul.f32 1.442695, %v694_v20 }
 0x14a   :  { %v2539_v10 = vpop.eup %1889  ;;  %1901 = vpow2.f32 %v219_v58  ;;  %v710_v4 = vmul.f32 1.442695, %v697_v49 }
 0x14b   :  { %259 = vperm.xlu0 %1866, %v2536_v15   ;;  %v2548_v8 = vpop.eup %1891  ;;  %1903 = vpow2.f32 %v706_v47 }
 0x14c   :  { %725 = vperm.xlu1 %1867, %v2539_v10   ;;  %v2550_v36 = vpop.eup %1893  ;;  %1905 = vpow2.f32 %v223_v0 }
 0x14d   :  { %v2558_v41 = vpop.eup %1895  ;;  %1907 = vpow2.f32 %v712_v62 }
 0x14e   :  { %v2560_v14 = vpop.eup %1897  ;;  %1909 = vpow2.f32 %v458_v25 }
 0x14f   :  { %v2562_v13 = vpop.eup %1899  ;;  %1911 = vpow2.f32 %v466_v53 }
 0x150   :  { %v2570_v12 = vpop.eup %1901  ;;  %1913 = vpow2.f32 %v704_v43 }
 0x151   :  { %v2572_v50 = vpop.eup %1903  ;;  %1915 = vpow2.f32 %v710_v4 }
 0x152   :  { %v2578_v61 = vpop.eup %1905 }
 0x153   :  { %502 = vperm.xlu0 %1866, %v2548_v8   ;;  %v2580_v18 = vpop.eup %1907 }
 0x154   :  { %737 = vperm.xlu1 %1867, %v2550_v36   ;;  %v2586_v56 = vpop.eup %1909 }
 0x155   :  { %v2591_v22 = vpop.eup %1911 }
 0x156   :  { %v2595_v11 = vpop.eup %1913 }
 0x157   :  { %v2598_v57 = vpop.eup %1915 }
 0x15b   :  { %728 = vperm.xlu0 %1866, %v2560_v14   ;;  %244 = vperm.xlu2 %1868, %v2558_v41  }
 0x15c   :  { %746 = vperm.xlu1 %1867, %v2562_v13  }
 0x163   :  { %734 = vperm.xlu0 %1866, %v2572_v50   ;;  %247 = vperm.xlu2 %1868, %v2570_v12  }
 0x16b   :  { %743 = vperm.xlu0 %1866, %v2580_v18   ;;  %253 = vperm.xlu2 %1868, %v2578_v61  }
 0x173   :  { %484 = vperm.xlu2 %1868, %v2586_v56  }
 0x17b   :  { %496 = vperm.xlu2 %1868, %v2591_v22  }
 0x183   :  { %731 = vperm.xlu2 %1868, %v2595_v11  }
 0x18b   :  { %740 = vperm.xlu2 %1868, %v2598_v57  }
 0x18c   :  { %v2601_v33 = vpop.permute.xlu1 %241 }
 0x194   :  { %v2605_v23 = vpop.permute.xlu1 %250 }
 0x1a5   :  { %v2603_v37 = vpop.permute.xlu0 %487 }
 0x1ad   :  { %v2610_v17 = vpop.permute.xlu0 %493 }
 0x1b6   :  { %v917_v3 = vpop.xlane.xlu2 %916 }
 0x1b7   :  { %v921_v21 = vperm.slane %v917_v3, 2  ;;  %v920_v31 = vperm.slane %v917_v3, 1  ;;  %v919_v26 = vperm.slane %v917_v3, 0  ;;  %v925_v16 = vperm.slane %v917_v3, 6 }
 0x1b8   :  { %v924_v58 = vperm.slane %v917_v3, 5  ;;  %v922_v5 = vperm.slane %v917_v3, 3  ;;  %v923_v30 = vperm.slane %v917_v3, 4  ;;  %v926_v49 = vperm.slane %v917_v3, 7 }
 0x1b9   :  { %v937_v9 = vsub.f32 %v2435_v1, %v921_v21  ;;  %v936_v45 = vsub.f32 %v2455_v19, %v920_v31  ;;  %v935_v2 = vsub.f32 %v2467_v42, %v919_v26  ;;  %v941_v0 = vsub.f32 %v2512_v39, %v925_v16  ;;  %v2617_v42 = vpop.permute.xlu1 %256 }
 0x1ba   :  { %v940_v1 = vsub.f32 %v2437_v24, %v924_v58  ;;  %v938_v19 = vsub.f32 %v2488_v63, %v922_v5  ;;  %v239_v63 = vpop.permute.xlu0 %238  ;;  %v939_v55 = vsub.f32 %v2470_v27, %v923_v30  ;;  %v942_v26 = vsub.f32 %v2500_v32, %v926_v49 }
 0x1bb   :  { %v947_v47 = vmul.f32 1.442695, %v937_v9  ;;  %v945_v40 = vmul.f32 1.442695, %v936_v45  ;;  %v943_v51 = vmul.f32 1.442695, %v935_v2  ;;  %v508_v30 = vperm.slane %v2610_v17, %v2289_v48 }
 0x1bc   :  { %v955_v46 = vmul.f32 1.442695, %v941_v0  ;;  %v953_v54 = vmul.f32 1.442695, %v940_v1  ;;  %v949_v34 = vmul.f32 1.442695, %v938_v19  ;;  %v506_v0 = vperm.slane %v2603_v37, %v2289_v48 }
 0x1bd   :  { %1917 = vpow2.f32 %v947_v47  ;;  %v951_v44 = vmul.f32 1.442695, %v939_v55  ;;  %v957_v9 = vmul.f32 1.442695, %v942_v26  ;;  %v262_v26 = vperm.slane %v2601_v33, %v2289_v48 }
 0x1be   :  { %v2613_v62 = vpop.permute.xlu2 %244  ;;  %1919 = vpow2.f32 %v945_v40 }
 0x1bf   :  { %1921 = vpow2.f32 %v943_v51 }
 0x1c0   :  { %1923 = vpow2.f32 %v955_v46 }
 0x1c1   :  { %1925 = vpow2.f32 %v953_v54  ;;  %v482_v20 = vpop.permute.xlu1 %481 }
 0x1c2   :  { %1927 = vpow2.f32 %v949_v34  ;;  %v260_v27 = vpop.permute.xlu0 %259  ;;  %v504_v40 = vperm.slane %v482_v20, %v2289_v48  ;;  %v261_v20 = vperm.slane %v239_v63, %v2289_v48 }
 0x1c3   :  { %v2619_v25 = vpop.eup %1917  ;;  %1929 = vpow2.f32 %v951_v44  ;;  %v263_v44 = vperm.slane %v2613_v62, %v2289_v48 }
 0x1c4   :  { %v2621_v53 = vpop.eup %1919  ;;  %974 = vperm.xlu2 %1868, %v2619_v25   ;;  %1931 = vpow2.f32 %v957_v9  ;;  %v269_v17 = vsel %vm169_vm1, %v262_v26, %v261_v20 }
 0x1c5   :  { %v2624_v39 = vpop.eup %1921  ;;  %971 = vperm.xlu1 %1867, %v2621_v53  }
 0x1c6   :  { %968 = vperm.xlu0 %1866, %v2624_v39   ;;  %v248_v24 = vpop.permute.xlu2 %247  ;;  %v2629_v43 = vpop.eup %1923 }
 0x1c7   :  { %v2631_v4 = vpop.eup %1925  ;;  %v264_v9 = vperm.slane %v248_v24, %v2289_v48  ;;  %v265_v24 = vperm.slane %v2605_v23, %v2289_v48 }
 0x1c8   :  { %v2634_v21 = vpop.eup %1927 }
 0x1c9   :  { %v491_v45 = vpop.permute.xlu1 %490  ;;  %v2639_v2 = vpop.eup %1929 }
 0x1ca   :  { %v503_v16 = vpop.permute.xlu0 %502  ;;  %v2642_v58 = vpop.eup %1931  ;;  %v507_v19 = vperm.slane %v491_v45, %v2289_v48 }
 0x1cb   :  { %v511_v62 = vperm.slane %v503_v16, %v2289_v48 }
 0x1cc   :  { %986 = vperm.xlu2 %1868, %v2629_v43  }
 0x1cd   :  { %983 = vperm.xlu1 %1867, %v2631_v4  }
 0x1ce   :  { %977 = vperm.xlu0 %1866, %v2634_v21   ;;  %v254_v31 = vpop.permute.xlu2 %253 }
 0x1cf   :  { %v266_v33 = vperm.slane %v254_v31, %v2289_v48  ;;  %v267_v31 = vperm.slane %v2617_v42, %v2289_v48 }
 0x1d1   :  { %v500_v47 = vpop.permute.xlu1 %499 }
 0x1d2   :  { %v729_v46 = vpop.permute.xlu0 %728 }
 0x1d6   :  { %980 = vperm.xlu0 %1866, %v2639_v2   ;;  %v485_v3 = vpop.permute.xlu2 %484 }
 0x1d7   :  { %v505_v5 = vperm.slane %v485_v3, %v2289_v48  ;;  %v510_v3 = vperm.slane %v500_v47, %v2289_v48 }
 0x1d9   :  { %v512_v51 = vsel %vm169_vm1, %v505_v5, %v504_v40  ;;  %v726_v55 = vpop.permute.xlu1 %725  ;;  %v270_v5 = vsel %vm171_vm2, %v263_v44, %v269_v17  ;;  %v268_v44 = vperm.slane %v260_v27, %v2289_v48 }
 0x1da   :  { %v513_v1 = vsel %vm171_vm2, %v506_v0, %v512_v51  ;;  %v271_v40 = vsel %vm173_vm3, %v264_v9, %v270_v5  ;;  %v735_v51 = vpop.permute.xlu0 %734  ;;  %v748_v0 = vperm.slane %v726_v55, %v2289_v48 }
 0x1db   :  { %v514_v34 = vsel %vm173_vm3, %v507_v19, %v513_v1  ;;  %v751_v20 = vperm.slane %v735_v51, %v2289_v48 }
 0x1dc   :  { %v515_v37 = vsel %vm175_vm4, %v508_v30, %v514_v34 }
 0x1de   :  { %989 = vperm.xlu0 %1866, %v2642_v58   ;;  %v497_v32 = vpop.permute.xlu2 %496 }
 0x1df   :  { %v509_v54 = vperm.slane %v497_v32, %v2289_v48  ;;  %v749_v32 = vperm.slane %v729_v46, %v2289_v48 }
 0x1e1   :  { %v516_v45 = vsel %vm177_vm5, %v509_v54, %v515_v37  ;;  %v738_v19 = vpop.permute.xlu1 %737  ;;  %v272_v54 = vsel %vm175_vm4, %v265_v24, %v271_v40  ;;  %v756_v16 = vsel %vm169_vm1, %v749_v32, %v748_v0 }
 0x1e2   :  { %v517_v63 = vsel %vm179_vm6, %v510_v3, %v516_v45  ;;  %v273_v34 = vsel %vm177_vm5, %v266_v33, %v272_v54  ;;  %v752_v26 = vperm.slane %v738_v19, %v2289_v48  ;;  %v744_v9 = vpop.permute.xlu0 %743 }
 0x1e3   :  { %v518_v1 = vsel %vm181_vm7, %v511_v62, %v517_v63  ;;  %v274_v55 = vsel %vm179_vm6, %v267_v31, %v273_v34  ;;  %v754_v5 = vperm.slane %v744_v9, %v2289_v48 }
 0x1e4   :  { %v520_v23 = vsel %vm184_vm8, %v518_v1, 0.0  ;;  %v275_v42 = vsel %vm181_vm7, %v268_v44, %v274_v55 }
 0x1e5   :  { %v277_v63 = vsel %vm184_vm8, %v275_v42, 0.0 }
 0x1e6   :  { %v732_v49 = vpop.permute.xlu2 %731 }
 0x1e7   :  { %v750_v47 = vperm.slane %v732_v49, %v2289_v48 }
 0x1e9   :  { %v757_v46 = vsel %vm171_vm2, %v750_v47, %v756_v16  ;;  %v747_v17 = vpop.permute.xlu1 %746 }
 0x1ea   :  { %v758_v37 = vsel %vm173_vm3, %v751_v20, %v757_v46  ;;  %v755_v62 = vperm.slane %v747_v17, %v2289_v48 }
 0x1eb   :  { %v759_v45 = vsel %vm175_vm4, %v752_v26, %v758_v37 }
 0x1ee   :  { %v741_v30 = vpop.permute.xlu2 %740 }
 0x1ef   :  { %v753_v49 = vperm.slane %v741_v30, %v2289_v48 }
 0x1f1   :  { %v760_v3 = vsel %vm177_vm5, %v753_v49, %v759_v45 }
 0x1f2   :  { %v761_v27 = vsel %vm179_vm6, %v754_v5, %v760_v3 }
 0x1f3   :  { %v762_v40 = vsel %vm181_vm7, %v755_v62, %v761_v27 }
 0x1f4   :  { %v764_v32 = vsel %vm184_vm8, %v762_v40, 0.0 }
 0x1f5   :  { %521 = vadd.xlane.f32.xlu2 %v520_v23 }
 0x1fd   :  { %278 = vadd.xlane.f32.xlu2 %v277_v63 }
 0x205   :  { %765 = vadd.xlane.f32.xlu2 %v764_v32 }
 0x21e   :  { %v975_v47 = vpop.permute.xlu2 %974 }
 0x21f   :  { %v993_v16 = vperm.slane %v975_v47, %v2289_v48 }
 0x226   :  { %v987_v55 = vpop.permute.xlu2 %986 }
 0x227   :  { %v997_v49 = vperm.slane %v987_v55, %v2289_v48  ;;  %v2741_v55 = vld [vmem:[%s3202_s0] sm:$0x1f] }
 0x237   :  { %v972_v51 = vpop.permute.xlu1 %971 }
 0x238   :  { %v969_v33 = vpop.permute.xlu0 %968  ;;  %v992_v0 = vperm.slane %v972_v51, %v2289_v48 }
 0x239   :  { %v991_v1 = vperm.slane %v969_v33, %v2289_v48 }
 0x23b   :  { %v999_v19 = vsel %vm169_vm1, %v992_v0, %v991_v1 }
 0x23c   :  { %v1000_v30 = vsel %vm171_vm2, %v993_v16, %v999_v19 }
 0x23f   :  { %v984_v46 = vpop.permute.xlu1 %983 }
 0x240   :  { %v978_v24 = vpop.permute.xlu0 %977  ;;  %v996_v44 = vperm.slane %v984_v46, %v2289_v48 }
 0x241   :  { %v994_v54 = vperm.slane %v978_v24, %v2289_v48 }
 0x243   :  { %v1001_v23 = vsel %vm173_vm3, %v994_v54, %v1000_v30 }
 0x248   :  { %v981_v34 = vpop.permute.xlu0 %980 }
 0x249   :  { %v995_v31 = vperm.slane %v981_v34, %v2289_v48 }
 0x24b   :  { %v1002_v20 = vsel %vm175_vm4, %v995_v31, %v1001_v23  ;;  %v2735_v23 = vld [vmem:[%s3203_s1] sm:$0x1f] }
 0x24c   :  { %v1003_v37 = vsel %vm177_vm5, %v996_v44, %v1002_v20 }
 0x24d   :  { %v1004_v42 = vsel %vm179_vm6, %v997_v49, %v1003_v37 }
 0x250   :  { %v990_v26 = vpop.permute.xlu0 %989 }
 0x251   :  { %v998_v9 = vperm.slane %v990_v26, %v2289_v48 }
 0x253   :  { %v1005_v45 = vsel %vm181_vm7, %v998_v9, %v1004_v42  ;;  %v2752_v42 = vld [vmem:[%s3203_s1 + $0x10] sm:$0x1f] }
 0x254   :  { %v1007_v3 = vsel %vm184_vm8, %v1005_v45, 0.0 }
 0x255   :  { %1008 = vadd.xlane.f32.xlu1 %v1007_v3  ;;  %v2759_v3 = vld [vmem:[%s3202_s0 + $0x10] sm:$0x1f] }
 0x268   :  { %v522_v17 = vpop.xlane.xlu2 %521 }
 0x269   :  { %1933 = vrcp.f32 %v522_v17 }
 0x26f   :  { %v1934_v5 = vpop.eup %1933 }
 0x270   :  { %v526_v63 = vperm.slane %v1934_v5, 1  ;;  %v525_v27 = vperm.slane %v1934_v5, 0  ;;  %v528_v62 = vperm.slane %v1934_v5, 3  ;;  %v529_v48 = vperm.slane %v1934_v5, 4  ;;  %v279_v54 = vpop.xlane.xlu2 %278 }
 0x271   :  { %v527_v51 = vperm.slane %v1934_v5, 2  ;;  %v531_v0 = vperm.slane %v1934_v5, 6  ;;  %v530_v1 = vperm.slane %v1934_v5, 5 }
 0x272   :  { %v542_v40 = vmul.f32 %v2586_v56, %v526_v63  ;;  %v541_v32 = vmul.f32 %v2480_v60, %v525_v27  ;;  %v544_v33 = vmul.f32 %v2502_v35, %v528_v62  ;;  %v545_v24 = vmul.f32 %v2498_v28, %v529_v48 }
 0x273   :  { %v543_v47 = vmul.f32 %v2478_v38, %v527_v51  ;;  %v547_v19 = vmul.f32 %v2528_v52, %v531_v0  ;;  %v546_v56 = vmul.f32 %v2591_v22, %v530_v1  ;;  %v532_v60 = vperm.slane %v1934_v5, 7 }
 0x274   :  { %1246 = vperm.xlu0 %1866, %v542_v40   ;;  %1241 = vperm.xlu2 %1868, %v541_v32  }
 0x275   :  { %1256 = vperm.xlu1 %1867, %v544_v33   ;;  %v548_v35 = vmul.f32 %v2548_v8, %v532_v60 }
 0x278   :  { %v766_v16 = vpop.xlane.xlu2 %765 }
 0x27c   :  { %1261 = vperm.xlu0 %1866, %v545_v24   ;;  %1251 = vperm.xlu2 %1868, %v543_v47  }
 0x284   :  { %1271 = vperm.xlu0 %1866, %v547_v19   ;;  %1266 = vperm.xlu2 %1868, %v546_v56  }
 0x28c   :  { %1276 = vperm.xlu2 %1868, %v548_v35  }
 0x2c8   :  { %v1009_v34 = vpop.xlane.xlu1 %1008 }
 0x2c9   :  { %1935 = vrcp.f32 %v1009_v34 }
 0x2ca   :  { %1937 = vrcp.f32 %v279_v54 }
 0x2cb   :  { %1939 = vrcp.f32 %v766_v16 }
 0x2ce   :  { %v1242_v38 = vpop.permute.xlu2 %1241 }
 0x2cf   :  { %v2723_v28 = vpop.eup %1935  ;;  %v1279_v20 = vmul.f32 %v2735_v23, %v1242_v38  ;;  %v1360_v44 = vmul.f32 %v2741_v55, %v1242_v38 }
 0x2d0   :  { %v1015_v31 = vperm.slane %v2723_v28, 3  ;;  %v1013_v52 = vperm.slane %v2723_v28, 1  ;;  %v1012_v22 = vperm.slane %v2723_v28, 0  ;;  %v2730_v8 = vpop.eup %1937  ;;  %v1016_v49 = vperm.slane %v2723_v28, 4 }
 0x2d1   :  { %v282_v37 = vperm.slane %v2730_v8, 0  ;;  %v1287_v26 = vsel %vm126_vm0, %v1279_v20, 0.0  ;;  %v1368_v9 = vsel %vm126_vm0, %v1360_v44, 0.0  ;;  %v284_v47 = vperm.slane %v2730_v8, 2  ;;  %v2774_v60 = vpop.eup %1939 }
 0x2d2   :  { %v1031_v46 = vmul.f32 %v2634_v21, %v1015_v31  ;;  %v1029_v30 = vmul.f32 %v2621_v53, %v1013_v52  ;;  %v1028_v21 = vmul.f32 %v2624_v39, %v1012_v22  ;;  %v1014_v39 = vperm.slane %v2723_v28, 2 }
 0x2d3   :  { %v1288_v5 = vrot.slane %v1287_v26, 4  ;;  %v1369_v63 = vrot.slane %v1368_v9, 4  ;;  %v298_v27 = vmul.f32 %v2525_v7, %v282_v37  ;;  %v1032_v40 = vmul.f32 %v2639_v2, %v1016_v49  ;;  %v2792_v49 = vld [vmem:[%s3203_s1 + $0x8] sm:$0x1f] }
 0x2d4   :  { %1662 = vperm.xlu2 %1868, %v1031_v46   ;;  %1652 = vperm.xlu0 %1866, %v1029_v30   ;;  %v1030_v32 = vmul.f32 %v2619_v25, %v1014_v39  ;;  %v283_v0 = vperm.slane %v2730_v8, 1  ;;  %v1017_v7 = vperm.slane %v2723_v28, 5  ;;  %v286_v2 = vperm.slane %v2730_v8, 4 }
 0x2d5   :  { %1647 = vperm.xlu1 %1867, %v1028_v21   ;;  %v1289_v48 = vadd.f32 %v1288_v5, %v1287_v26  ;;  %v1370_v51 = vadd.f32 %v1369_v63, %v1368_v9  ;;  %v285_v25 = vperm.slane %v2730_v8, 3  ;;  %v288_v19 = vperm.slane %v2730_v8, 6  ;;  %v2818_v63 = vld [vmem:[%s3202_s0 + $0x18] sm:$0x1f] }
 0x2d6   :  { %v1252_v53 = vpop.permute.xlu2 %1251  ;;  %v287_v56 = vperm.slane %v2730_v8, 5  ;;  %v300_v34 = vmul.f32 %v2558_v41, %v284_v47  ;;  %v299_v38 = vmul.f32 %v2446_v6, %v283_v0  ;;  %v1033_v31 = vmul.f32 %v2631_v4, %v1017_v7  ;;  %v2830_v47 = vld [vmem:[%s3202_s0 + $0x28] sm:$0x1f] }
 0x2d7   :  { %v1281_v45 = vmul.f32 %v2752_v42, %v1252_v53  ;;  %v1362_v17 = vmul.f32 %v2759_v3, %v1252_v53  ;;  %v1290_v35 = vrot.slane %v1289_v48, 2  ;;  %v1371_v54 = vrot.slane %v1370_v51, 2 }
 0x2d8   :  { %v302_v22 = vmul.f32 %v2450_v59, %v286_v2  ;;  %v301_v30 = vmul.f32 %v2570_v12, %v285_v25  ;;  %v773_v20 = vperm.slane %v2774_v60, 4  ;;  %v2783_v44 = vmul.f32 %v2462_v29, %v288_v19  ;;  %v2798_v29 = vld [vmem:[%s3202_s0 + $0x8] sm:$0x1f] }
 0x2d9   :  { %v1301_v62 = vsel %vm126_vm0, %v1281_v45, 0.0  ;;  %v1382_v33 = vsel %vm126_vm0, %v1362_v17, 0.0  ;;  %v289_v41 = vperm.slane %v2730_v8, 7  ;;  %v1291_v21 = vadd.f32 %v1290_v35, %v1289_v48  ;;  %v2806_v45 = vld [vmem:[%s3203_s1 + $0x28] sm:$0x1f] }
 0x2da   :  { %v1302_v24 = vrot.slane %v1301_v62, 4  ;;  %v1383_v1 = vrot.slane %v1382_v33, 4  ;;  %v1372_v6 = vadd.f32 %v1371_v54, %v1370_v51  ;;  %v2787_v37 = vmul.f32 %v2578_v61, %v287_v56  ;;  %v2812_v17 = vld [vmem:[%s3203_s1 + $0x18] sm:$0x1f] }
 0x2db   :  { %v776_v26 = vperm.slane %v2774_v60, 7  ;;  %v770_v61 = vperm.slane %v2774_v60, 1  ;;  %v1292_v48 = vrot.slane %v1291_v21, 1 }
 0x2dc   :  { %1038 = vperm.xlu2 %1868, %v298_v27   ;;  %1667 = vperm.xlu0 %1866, %v1032_v40   ;;  %v1303_v16 = vadd.f32 %v1302_v24, %v1301_v62  ;;  %v1384_v52 = vadd.f32 %v1383_v1, %v1382_v33  ;;  %v2825_v33 = vmul.f32 %v2536_v15, %v289_v41  ;;  %v1373_v51 = vrot.slane %v1372_v6, 1 }
 0x2dd   :  { %1657 = vperm.xlu1 %1867, %v1030_v32   ;;  %v789_v32 = vmul.f32 %v2550_v36, %v773_v20  ;;  %v792_v19 = vmul.f32 %v2562_v13, %v776_v26  ;;  %v2838_v56 = vmul.f32 %v2560_v14, %v770_v61 }
 0x2de   :  { %v1267_v46 = vpop.permute.xlu2 %1266  ;;  %v1304_v53 = vrot.slane %v1303_v16, 2  ;;  %v1385_v9 = vrot.slane %v1384_v52, 2 }
 0x2df   :  { %v1284_v39 = vmul.f32 %v2806_v45, %v1267_v46  ;;  %v1365_v0 = vmul.f32 %v2830_v47, %v1267_v46 }
 0x2e0   :  { %v1305_v24 = vadd.f32 %v1304_v53, %v1303_v16  ;;  %v1386_v36 = vadd.f32 %v1385_v9, %v1384_v52 }
 0x2e1   :  { %v1322_v15 = vsel %vm126_vm0, %v1284_v39, 0.0  ;;  %v1403_v20 = vsel %vm126_vm0, %v1365_v0, 0.0 }
 0x2e2   :  { %v1306_v46 = vrot.slane %v1305_v24, 1  ;;  %v1387_v13 = vrot.slane %v1386_v36, 1 }
 0x2e4   :  { %1048 = vperm.xlu2 %1868, %v300_v34   ;;  %1043 = vperm.xlu0 %1866, %v299_v38   ;;  %v1293_v38 = vadd.f32 %v1292_v48, %v1291_v21  ;;  %v2850_v21 = vld [vmem:[%s3202_s0 + $0x20] sm:$0x1f]  ;;  %v1307_v39 = vadd.f32 %v1306_v46, %v1305_v24  ;;  %v2864_v48 = vld [vmem:[%s3202_s0 + $0x38] sm:$0x1f] }
 0x2e5   :  { %1672 = vperm.xlu1 %1867, %v1033_v31   ;;  %v1374_v31 = vadd.f32 %v1373_v51, %v1372_v6 }
 0x2e6   :  { %v1247_v4 = vpop.permute.xlu0 %1246  ;;  %v1277_v14 = vpop.permute.xlu2 %1276 }
 0x2e7   :  { %v1257_v59 = vpop.permute.xlu1 %1256  ;;  %v1280_v12 = vmul.f32 %v2792_v49, %v1247_v4  ;;  %v1361_v8 = vmul.f32 %v2798_v29, %v1247_v4  ;;  %v1367_v51 = vmul.f32 %v2864_v48, %v1277_v14 }
 0x2e8   :  { %v1282_v5 = vmul.f32 %v2812_v17, %v1257_v59  ;;  %v1363_v27 = vmul.f32 %v2818_v63, %v1257_v59  ;;  %v1323_v59 = vrot.slane %v1322_v15, 4 }
 0x2e9   :  { %v1294_v62 = vsel %vm126_vm0, %v1280_v12, 0.0  ;;  %v1375_v40 = vsel %vm126_vm0, %v1361_v8, 0.0  ;;  %v2844_v12 = vld [vmem:[%s3203_s1 + $0x20] sm:$0x1f] }
 0x2ea   :  { %v1308_v7 = vsel %vm126_vm0, %v1282_v5, 0.0  ;;  %v1389_v1 = vsel %vm126_vm0, %v1363_v27, 0.0  ;;  %v1295_v2 = vrot.slane %v1294_v62, 4  ;;  %v1376_v25 = vrot.slane %v1375_v40, 4 }
 0x2eb   :  { %v1309_v35 = vrot.slane %v1308_v7, 4  ;;  %v1390_v54 = vrot.slane %v1389_v1, 4  ;;  %v1404_v5 = vrot.slane %v1403_v20, 4 }
 0x2ec   :  { %1058 = vperm.xlu2 %1868, %v302_v22   ;;  %v1296_v16 = vadd.f32 %v1295_v2, %v1294_v62  ;;  %v1377_v34 = vadd.f32 %v1376_v25, %v1375_v40  ;;  %1053 = vperm.xlu0 %1866, %v301_v30   ;;  %v2858_v40 = vld [vmem:[%s3203_s1 + $0x38] sm:$0x1f] }
 0x2ed   :  { %1464 = vperm.xlu1 %1867, %v789_v32   ;;  %v1310_v41 = vadd.f32 %v1309_v35, %v1308_v7  ;;  %v1391_v53 = vadd.f32 %v1390_v54, %v1389_v1  ;;  %v1286_v32 = vmul.f32 %v2858_v40, %v1277_v14  ;;  %v1388_v7 = vadd.f32 %v1387_v13, %v1386_v36 }
 0x2ee   :  { %v1262_v52 = vpop.permute.xlu0 %1261  ;;  %v1297_v22 = vrot.slane %v1296_v16, 2  ;;  %v1378_v4 = vrot.slane %v1377_v34, 2  ;;  %v1405_v46 = vadd.f32 %v1404_v5, %v1403_v20  ;;  %v1417_v36 = vsel %vm126_vm0, %v1367_v51, 0.0  ;;  %v2878_v20 = vld [vmem:[%s3203_s1 + $0x30] sm:$0x1f] }
 0x2ef   :  { %v1283_v30 = vmul.f32 %v2844_v12, %v1262_v52  ;;  %v1364_v6 = vmul.f32 %v2850_v21, %v1262_v52  ;;  %v1311_v8 = vrot.slane %v1310_v41, 2  ;;  %v1392_v26 = vrot.slane %v1391_v53, 2 }
 0x2f0   :  { %v1298_v61 = vadd.f32 %v1297_v22, %v1296_v16  ;;  %v1379_v9 = vadd.f32 %v1378_v4, %v1377_v34  ;;  %v1324_v34 = vadd.f32 %v1323_v59, %v1322_v15  ;;  %v1336_v14 = vsel %vm126_vm0, %v1286_v32, 0.0 }
 0x2f1   :  { %v1315_v27 = vsel %vm126_vm0, %v1283_v30, 0.0  ;;  %v1396_v62 = vsel %vm126_vm0, %v1364_v6, 0.0  ;;  %v1312_v1 = vadd.f32 %v1311_v8, %v1310_v41  ;;  %v1393_v35 = vadd.f32 %v1392_v26, %v1391_v53 }
 0x2f2   :  { %v1299_v24 = vrot.slane %v1298_v61, 1  ;;  %v1380_v0 = vrot.slane %v1379_v9, 1  ;;  %v1316_v2 = vrot.slane %v1315_v27, 4  ;;  %v1397_v25 = vrot.slane %v1396_v62, 4 }
 0x2f3   :  { %v1394_v15 = vrot.slane %v1393_v35, 1  ;;  %v1325_v6 = vrot.slane %v1324_v34, 2  ;;  %v1406_v8 = vrot.slane %v1405_v46, 2 }
 0x2f4   :  { %1068 = vperm.xlu2 %1868, %v2783_v44   ;;  %v1300_v54 = vadd.f32 %v1299_v24, %v1298_v61  ;;  %v1381_v16 = vadd.f32 %v1380_v0, %v1379_v9  ;;  %1063 = vperm.xlu0 %1866, %v2787_v37   ;;  %v1317_v52 = vadd.f32 %v1316_v2, %v1315_v27  ;;  %v1337_v9 = vrot.slane %v1336_v14, 4 }
 0x2f5   :  { %1479 = vperm.xlu1 %1867, %v792_v19   ;;  %v1398_v22 = vadd.f32 %v1397_v25, %v1396_v62  ;;  %v1313_v19 = vrot.slane %v1312_v1, 1  ;;  %v771_v2 = vperm.slane %v2774_v60, 2  ;;  %v769_v25 = vperm.slane %v2774_v60, 0 }
 0x2f6   :  { %v1272_v4 = vpop.permute.xlu0 %1271  ;;  %v1351_v41 = vsel %vm169_vm1, %v1300_v54, %v1293_v38  ;;  %v1432_v13 = vsel %vm169_vm1, %v1381_v16, %v1374_v31  ;;  %v1318_v30 = vrot.slane %v1317_v52, 2  ;;  %v2884_v38 = vld [vmem:[%s3202_s0 + $0x30] sm:$0x1f] }
 0x2f7   :  { %v1352_v44 = vsel %vm171_vm2, %v1307_v39, %v1351_v41  ;;  %v1433_v53 = vsel %vm171_vm2, %v1388_v7, %v1432_v13  ;;  %v1399_v37 = vrot.slane %v1398_v22, 2  ;;  %v1285_v59 = vmul.f32 %v2878_v20, %v1272_v4 }
 0x2f8   :  { %v1366_v31 = vmul.f32 %v2884_v38, %v1272_v4  ;;  %v1319_v26 = vadd.f32 %v1318_v30, %v1317_v52  ;;  %v1418_v39 = vrot.slane %v1417_v36, 4  ;;  %v1314_v0 = vadd.f32 %v1313_v19, %v1312_v1 }
 0x2f9   :  { %v1400_v61 = vadd.f32 %v1399_v37, %v1398_v22  ;;  %v1329_v5 = vsel %vm126_vm0, %v1285_v59, 0.0  ;;  %v1395_v7 = vadd.f32 %v1394_v15, %v1393_v35  ;;  %v1326_v4 = vadd.f32 %v1325_v6, %v1324_v34 }
 0x2fa   :  { %v1410_v27 = vsel %vm126_vm0, %v1366_v31, 0.0  ;;  %v1320_v62 = vrot.slane %v1319_v26, 1  ;;  %v1330_v51 = vrot.slane %v1329_v5, 4  ;;  %v1407_v41 = vadd.f32 %v1406_v8, %v1405_v46 }
 0x2fb   :  { %v1401_v32 = vrot.slane %v1400_v61, 1  ;;  %v1411_v24 = vrot.slane %v1410_v27, 4  ;;  %v1353_v13 = vsel %vm173_vm3, %v1314_v0, %v1352_v44  ;;  %v1434_v30 = vsel %vm173_vm3, %v1395_v7, %v1433_v53 }
 0x2fc   :  { %1449 = vperm.xlu2 %1868, %v2838_v56   ;;  %1073 = vperm.xlu0 %1866, %v2825_v33   ;;  %v1321_v54 = vadd.f32 %v1320_v62, %v1319_v26  ;;  %v1331_v52 = vadd.f32 %v1330_v51, %v1329_v5  ;;  %v1338_v37 = vadd.f32 %v1337_v9, %v1336_v14  ;;  %v1327_v31 = vrot.slane %v1326_v4, 1 }
 0x2fd   :  { %v1402_v16 = vadd.f32 %v1401_v32, %v1400_v61  ;;  %v1412_v22 = vadd.f32 %v1411_v24, %v1410_v27  ;;  %v1419_v56 = vadd.f32 %v1418_v39, %v1417_v36  ;;  %v787_v15 = vmul.f32 %v2595_v11, %v771_v2 }
 0x2fe   :  { %v1354_v1 = vsel %vm175_vm4, %v1321_v54, %v1353_v13  ;;  %v1332_v35 = vrot.slane %v1331_v52, 2  ;;  %v785_v59 = vmul.f32 %v2539_v10, %v769_v25  ;;  %v1408_v26 = vrot.slane %v1407_v41, 1  ;;  %v2922_v13 = vld [vmem:[%s3200_s3] sm:$0xff] }
 0x2ff   :  { %v1435_v33 = vsel %vm175_vm4, %v1402_v16, %v1434_v30  ;;  %v1413_v19 = vrot.slane %v1412_v22, 2  ;;  %v1339_v34 = vrot.slane %v1338_v37, 2  ;;  %v1420_v46 = vrot.slane %v1419_v56, 2 }
 0x300   :  { %v1333_v44 = vadd.f32 %v1332_v35, %v1331_v52  ;;  %v774_v14 = vperm.slane %v2774_v60, 5  ;;  %v772_v36 = vperm.slane %v2774_v60, 3  ;;  %v1328_v53 = vadd.f32 %v1327_v31, %v1326_v4 }
 0x301   :  { %v1414_v6 = vadd.f32 %v1413_v19, %v1412_v22  ;;  %v1409_v8 = vadd.f32 %v1408_v26, %v1407_v41  ;;  %v1340_v61 = vadd.f32 %v1339_v34, %v1338_v37  ;;  %v1421_v9 = vadd.f32 %v1420_v46, %v1419_v56  ;;  %v2916_v41 = vld [vmem:[%s3199_s2] sm:$0xff] }
 0x302   :  { %v1334_v39 = vrot.slane %v1333_v44, 1  ;;  %v790_v10 = vmul.f32 %v2598_v57, %v774_v14  ;;  %v1355_v5 = vsel %vm177_vm5, %v1328_v53, %v1354_v1  ;;  %v788_v62 = vmul.f32 %v2572_v50, %v772_v36 }
 0x303   :  { %v1415_v11 = vrot.slane %v1414_v6, 1  ;;  %v1436_v27 = vsel %vm177_vm5, %v1409_v8, %v1435_v33  ;;  %v1341_v32 = vrot.slane %v1340_v61, 1  ;;  %v1422_v51 = vrot.slane %v1421_v9, 1 }
 0x304   :  { %1454 = vperm.xlu2 %1868, %v787_v15   ;;  %1444 = vperm.xlu0 %1866, %v785_v59   ;;  %v1335_v24 = vadd.f32 %v1334_v39, %v1333_v44  ;;  %v1018_v7 = vperm.slane %v2723_v28, 6  ;;  %v775_v2 = vperm.slane %v2774_v60, 6 }
 0x305   :  { %v1416_v0 = vadd.f32 %v1415_v11, %v1414_v6  ;;  %v1342_v25 = vadd.f32 %v1341_v32, %v1340_v61  ;;  %v1423_v54 = vadd.f32 %v1422_v51, %v1421_v9 }
 0x306   :  { %v1356_v57 = vsel %vm179_vm6, %v1335_v24, %v1355_v5  ;;  %v1034_v52 = vmul.f32 %v2629_v43, %v1018_v7  ;;  %v791_v4 = vmul.f32 %v2580_v18, %v775_v2  ;;  %v1019_v18 = vperm.slane %v2723_v28, 7 }
 0x307   :  { %v1437_v16 = vsel %vm179_vm6, %v1416_v0, %v1436_v27  ;;  %v1357_v50 = vsel %vm181_vm7, %v1342_v25, %v1356_v57 }
 0x308   :  { %v1438_v22 = vsel %vm181_vm7, %v1423_v54, %v1437_v16  ;;  %v1359_v60 = vmul.f32 %v2916_v41, %v1357_v50  ;;  %v1035_v37 = vmul.f32 %v2642_v58, %v1019_v18 }
 0x309   :  { %v1440_v43 = vmul.f32 %v2922_v13, %v1438_v22 }
 0x30b   :  { %v2925_v30 = vadd.f32 %v1440_v43, %v1359_v60 }
 0x30c   :  { %1469 = vperm.xlu2 %1868, %v790_v10   ;;  %1459 = vperm.xlu0 %1866, %v788_v62  }
 0x314   :  { %1677 = vperm.xlu2 %1868, %v1034_v52   ;;  %1474 = vperm.xlu0 %1866, %v791_v4  }
 0x31c   :  { %1682 = vperm.xlu0 %1866, %v1035_v37  }
 0x32e   :  { %v1663_v56 = vpop.permute.xlu2 %1662 }
 0x32f   :  { %v1688_v1 = vmul.f32 %v2812_v17, %v1663_v56  ;;  %v1769_v33 = vmul.f32 %v2818_v63, %v1663_v56 }
 0x331   :  { %v1714_v35 = vsel %vm126_vm0, %v1688_v1, 0.0  ;;  %v1795_v19 = vsel %vm126_vm0, %v1769_v33, 0.0 }
 0x332   :  { %v1715_v15 = vrot.slane %v1714_v35, 4  ;;  %v1796_v59 = vrot.slane %v1795_v19, 4 }
 0x334   :  { %v1716_v31 = vadd.f32 %v1715_v15, %v1714_v35  ;;  %v1797_v26 = vadd.f32 %v1796_v59, %v1795_v19 }
 0x336   :  { %v1039_v34 = vpop.permute.xlu2 %1038  ;;  %v1717_v6 = vrot.slane %v1716_v31, 2  ;;  %v1798_v14 = vrot.slane %v1797_v26, 2 }
 0x337   :  { %v1076_v46 = vmul.f32 %v2741_v55, %v1039_v34  ;;  %v1157_v28 = vmul.f32 %v2735_v23, %v1039_v34 }
 0x338   :  { %v1718_v9 = vadd.f32 %v1717_v6, %v1716_v31  ;;  %v1799_v39 = vadd.f32 %v1798_v14, %v1797_v26 }
 0x339   :  { %v1084_v58 = vsel %vm126_vm0, %v1076_v46, 0.0  ;;  %v1165_v44 = vsel %vm126_vm0, %v1157_v28, 0.0 }
 0x33a   :  { %v1085_v36 = vrot.slane %v1084_v58, 4  ;;  %v1166_v53 = vrot.slane %v1165_v44, 4  ;;  %v1719_v24 = vrot.slane %v1718_v9, 1  ;;  %v1800_v0 = vrot.slane %v1799_v39, 1 }
 0x33c   :  { %v1086_v8 = vadd.f32 %v1085_v36, %v1084_v58  ;;  %v1167_v61 = vadd.f32 %v1166_v53, %v1165_v44  ;;  %v2941_v52 = vadd.f32 %v1719_v24, %v1718_v9  ;;  %v2943_v50 = vadd.f32 %v1800_v0, %v1799_v39 }
 0x33e   :  { %v1049_v11 = vpop.permute.xlu2 %1048  ;;  %v1087_v27 = vrot.slane %v1086_v8, 2  ;;  %v1168_v62 = vrot.slane %v1167_v61, 2 }
 0x33f   :  { %v1078_v10 = vmul.f32 %v2759_v3, %v1049_v11  ;;  %v1159_v5 = vmul.f32 %v2752_v42, %v1049_v11 }
 0x340   :  { %v1088_v25 = vadd.f32 %v1087_v27, %v1086_v8  ;;  %v1169_v54 = vadd.f32 %v1168_v62, %v1167_v61 }
 0x341   :  { %v1098_v32 = vsel %vm126_vm0, %v1078_v10, 0.0  ;;  %v1179_v51 = vsel %vm126_vm0, %v1159_v5, 0.0 }
 0x342   :  { %v1099_v7 = vrot.slane %v1098_v32, 4  ;;  %v1180_v2 = vrot.slane %v1179_v51, 4  ;;  %v1089_v35 = vrot.slane %v1088_v25, 1  ;;  %v1170_v19 = vrot.slane %v1169_v54, 1 }
 0x344   :  { %v1100_v57 = vadd.f32 %v1099_v7, %v1098_v32  ;;  %v1181_v16 = vadd.f32 %v1180_v2, %v1179_v51  ;;  %v2957_v8 = vadd.f32 %v1089_v35, %v1088_v25 }
 0x346   :  { %v1101_v22 = vrot.slane %v1100_v57, 2  ;;  %v1182_v4 = vrot.slane %v1181_v16, 2  ;;  %v1059_v60 = vpop.permute.xlu2 %1058  ;;  %v1653_v43 = vpop.permute.xlu0 %1652 }
 0x347   :  { %v1080_v18 = vmul.f32 %v2850_v21, %v1059_v60  ;;  %v1161_v37 = vmul.f32 %v2844_v12, %v1059_v60  ;;  %v1648_v56 = vpop.permute.xlu1 %1647  ;;  %v1686_v1 = vmul.f32 %v2792_v49, %v1653_v43  ;;  %v1767_v33 = vmul.f32 %v2798_v29, %v1653_v43 }
 0x348   :  { %v1685_v15 = vmul.f32 %v2735_v23, %v1648_v56  ;;  %v1766_v59 = vmul.f32 %v2741_v55, %v1648_v56  ;;  %v1102_v28 = vadd.f32 %v1101_v22, %v1100_v57  ;;  %v1183_v58 = vadd.f32 %v1182_v4, %v1181_v16 }
 0x349   :  { %v1112_v31 = vsel %vm126_vm0, %v1080_v18, 0.0  ;;  %v1193_v26 = vsel %vm126_vm0, %v1161_v37, 0.0  ;;  %v1700_v34 = vsel %vm126_vm0, %v1686_v1, 0.0  ;;  %v1781_v46 = vsel %vm126_vm0, %v1767_v33, 0.0 }
 0x34a   :  { %v1113_v44 = vrot.slane %v1112_v31, 4  ;;  %v1194_v6 = vrot.slane %v1193_v26, 4  ;;  %v1693_v14 = vsel %vm126_vm0, %v1685_v15, 0.0  ;;  %v1774_v36 = vsel %vm126_vm0, %v1766_v59, 0.0 }
 0x34b   :  { %v1701_v53 = vrot.slane %v1700_v34, 4  ;;  %v1782_v23 = vrot.slane %v1781_v46, 4  ;;  %v2959_v55 = vadd.f32 %v1170_v19, %v1169_v54  ;;  %v1694_v39 = vrot.slane %v1693_v14, 4 }
 0x34c   :  { %v1114_v61 = vadd.f32 %v1113_v44, %v1112_v31  ;;  %v1195_v9 = vadd.f32 %v1194_v6, %v1193_v26  ;;  %v1775_v11 = vrot.slane %v1774_v36, 4  ;;  %v1103_v27 = vrot.slane %v1102_v28, 1 }
 0x34d   :  { %v1702_v10 = vadd.f32 %v1701_v53, %v1700_v34  ;;  %v1783_v5 = vadd.f32 %v1782_v23, %v1781_v46  ;;  %v1184_v62 = vrot.slane %v1183_v58, 1  ;;  %v1695_v0 = vadd.f32 %v1694_v39, %v1693_v14 }
 0x34e   :  { %v1115_v32 = vrot.slane %v1114_v61, 2  ;;  %v1196_v51 = vrot.slane %v1195_v9, 2  ;;  %v1069_v24 = vpop.permute.xlu2 %1068  ;;  %v1776_v7 = vadd.f32 %v1775_v11, %v1774_v36  ;;  %v1668_v16 = vpop.permute.xlu0 %1667  ;;  %v2963_v56 = vadd.f32 %v1103_v27, %v1102_v28 }
 0x34f   :  { %v1703_v2 = vrot.slane %v1702_v10, 2  ;;  %v1784_v57 = vrot.slane %v1783_v5, 2  ;;  %v1082_v54 = vmul.f32 %v2884_v38, %v1069_v24  ;;  %v1163_v4 = vmul.f32 %v2878_v20, %v1069_v24  ;;  %v1658_v26 = vpop.permute.xlu1 %1657 }
 0x350   :  { %v1116_v25 = vadd.f32 %v1115_v32, %v1114_v61  ;;  %v1197_v22 = vadd.f32 %v1196_v51, %v1195_v9  ;;  %v1696_v60 = vrot.slane %v1695_v0, 2  ;;  %v1777_v43 = vrot.slane %v1776_v7, 2 }
 0x351   :  { %v1704_v18 = vadd.f32 %v1703_v2, %v1702_v10  ;;  %v1785_v37 = vadd.f32 %v1784_v57, %v1783_v5  ;;  %v2965_v1 = vadd.f32 %v1184_v62, %v1183_v58  ;;  %v1126_v33 = vsel %vm126_vm0, %v1082_v54, 0.0 }
 0x352   :  { %v1207_v35 = vsel %vm126_vm0, %v1163_v4, 0.0  ;;  %v1697_v19 = vadd.f32 %v1696_v60, %v1695_v0  ;;  %v1778_v15 = vadd.f32 %v1777_v43, %v1776_v7  ;;  %v1117_v34 = vrot.slane %v1116_v25, 1 }
 0x353   :  { %v1705_v59 = vrot.slane %v1704_v18, 1  ;;  %v1786_v31 = vrot.slane %v1785_v37, 1  ;;  %v1198_v46 = vrot.slane %v1197_v22, 1  ;;  %v1127_v44 = vrot.slane %v1126_v33, 4 }
 0x354   :  { %v1208_v6 = vrot.slane %v1207_v35, 4  ;;  %v1698_v14 = vrot.slane %v1697_v19, 1  ;;  %v1779_v36 = vrot.slane %v1778_v15, 1  ;;  %v1687_v61 = vmul.f32 %v2752_v42, %v1658_v26 }
 0x355   :  { %v1706_v53 = vadd.f32 %v1705_v59, %v1704_v18  ;;  %v1787_v28 = vadd.f32 %v1786_v31, %v1785_v37  ;;  %v1128_v23 = vadd.f32 %v1127_v44, %v1126_v33  ;;  %v1768_v9 = vmul.f32 %v2759_v3, %v1658_v26 }
 0x356   :  { %v1209_v58 = vadd.f32 %v1208_v6, %v1207_v35  ;;  %v1699_v39 = vadd.f32 %v1698_v14, %v1697_v19  ;;  %v1780_v11 = vadd.f32 %v1779_v36, %v1778_v15  ;;  %v1689_v10 = vmul.f32 %v2844_v12, %v1668_v16  ;;  %v2973_v27 = vpop.permute.xlu0 %1043  ;;  %v1450_v54 = vpop.permute.xlu2 %1449 }
 0x357   :  { %v1770_v5 = vmul.f32 %v2850_v21, %v1668_v16  ;;  %v1129_v62 = vrot.slane %v1128_v23, 2  ;;  %v1707_v51 = vsel %vm126_vm0, %v1687_v61, 0.0  ;;  %v1788_v24 = vsel %vm126_vm0, %v1768_v9, 0.0 }
 0x358   :  { %v1210_v32 = vrot.slane %v1209_v58, 2  ;;  %v2977_v0 = vadd.f32 %v1117_v34, %v1116_v25  ;;  %v2979_v7 = vadd.f32 %v1198_v46, %v1197_v22  ;;  %v1708_v2 = vrot.slane %v1707_v51, 4  ;;  %v1673_v46 = vpop.permute.xlu1 %1672 }
 0x359   :  { %v1789_v57 = vrot.slane %v1788_v24, 4  ;;  %v1130_v4 = vadd.f32 %v1129_v62, %v1128_v23  ;;  %v1721_v43 = vsel %vm126_vm0, %v1689_v10, 0.0  ;;  %v1802_v16 = vsel %vm126_vm0, %v1770_v5, 0.0 }
 0x35a   :  { %v1211_v60 = vadd.f32 %v1210_v32, %v1209_v58  ;;  %v1709_v18 = vadd.f32 %v1708_v2, %v1707_v51  ;;  %v1722_v33 = vrot.slane %v1721_v43, 4  ;;  %v1803_v35 = vrot.slane %v1802_v16, 4 }
 0x35b   :  { %v1790_v37 = vadd.f32 %v1789_v57, %v1788_v24  ;;  %v1757_v19 = vsel %vm169_vm1, %v1706_v53, %v1699_v39  ;;  %v1838_v25 = vsel %vm169_vm1, %v1787_v28, %v1780_v11  ;;  %v1483_v22 = vmul.f32 %v2798_v29, %v1450_v54 }
 0x35c   :  { %v1564_v15 = vmul.f32 %v2792_v49, %v1450_v54  ;;  %v1710_v59 = vrot.slane %v1709_v18, 2  ;;  %v1723_v26 = vadd.f32 %v1722_v33, %v1721_v43  ;;  %v1804_v34 = vadd.f32 %v1803_v35, %v1802_v16 }
 0x35d   :  { %v1791_v31 = vrot.slane %v1790_v37, 2  ;;  %v1131_v44 = vrot.slane %v1130_v4, 1  ;;  %v1212_v6 = vrot.slane %v1211_v60, 1  ;;  %v1497_v14 = vsel %vm126_vm0, %v1483_v22, 0.0 }
 0x35e   :  { %v1578_v36 = vsel %vm126_vm0, %v1564_v15, 0.0  ;;  %v1711_v23 = vadd.f32 %v1710_v59, %v1709_v18  ;;  %v1724_v53 = vrot.slane %v1723_v26, 2  ;;  %v1805_v61 = vrot.slane %v1804_v34, 2  ;;  %v2989_v28 = vpop.permute.xlu0 %1053 }
 0x35f   :  { %v1792_v58 = vadd.f32 %v1791_v31, %v1790_v37  ;;  %v1498_v9 = vrot.slane %v1497_v14, 4  ;;  %v1579_v39 = vrot.slane %v1578_v36, 4  ;;  %v1690_v11 = vmul.f32 %v2806_v45, %v1673_v46 }
 0x360   :  { %v1771_v10 = vmul.f32 %v2830_v47, %v1673_v46  ;;  %v1712_v5 = vrot.slane %v1711_v23, 1  ;;  %v1725_v32 = vadd.f32 %v1724_v53, %v1723_v26  ;;  %v1806_v51 = vadd.f32 %v1805_v61, %v1804_v34 }
 0x361   :  { %v1793_v62 = vrot.slane %v1792_v58, 1  ;;  %v1499_v24 = vadd.f32 %v1498_v9, %v1497_v14  ;;  %v1580_v2 = vadd.f32 %v1579_v39, %v1578_v36  ;;  %v1728_v57 = vsel %vm126_vm0, %v1690_v11, 0.0 }
 0x362   :  { %v1809_v54 = vsel %vm126_vm0, %v1771_v10, 0.0  ;;  %v1713_v43 = vadd.f32 %v1712_v5, %v1711_v23  ;;  %v1726_v18 = vrot.slane %v1725_v32, 1  ;;  %v1807_v37 = vrot.slane %v1806_v51, 1 }
 0x363   :  { %v1794_v16 = vadd.f32 %v1793_v62, %v1792_v58  ;;  %v1500_v33 = vrot.slane %v1499_v24, 2  ;;  %v1581_v35 = vrot.slane %v1580_v2, 2  ;;  %v1729_v22 = vrot.slane %v1728_v57, 4  ;;  %v1455_v58 = vpop.permute.xlu2 %1454 }
 0x364   :  { %v1810_v15 = vrot.slane %v1809_v54, 4  ;;  %v2995_v59 = vadd.f32 %v1131_v44, %v1130_v4  ;;  %v2997_v31 = vadd.f32 %v1212_v6, %v1211_v60  ;;  %v1758_v26 = vsel %vm171_vm2, %v1713_v43, %v1757_v19 }
 0x365   :  { %v1839_v34 = vsel %vm171_vm2, %v1794_v16, %v1838_v25  ;;  %v1727_v46 = vadd.f32 %v1726_v18, %v1725_v32  ;;  %v3001_v14 = vadd.f32 %v1807_v37, %v1806_v51  ;;  %v1501_v36 = vadd.f32 %v1500_v33, %v1499_v24 }
 0x366   :  { %v1582_v23 = vadd.f32 %v1581_v35, %v1580_v2  ;;  %v1759_v53 = vsel %vm173_vm3, %v2941_v52, %v1758_v26  ;;  %v3007_v61 = vsel %vm173_vm3, %v2943_v50, %v1839_v34  ;;  %v1730_v4 = vadd.f32 %v1729_v22, %v1728_v57  ;;  %v3009_v44 = vpop.permute.xlu0 %1063  ;;  %v1465_v50 = vpop.permute.xlu1 %1464 }
 0x367   :  { %v1811_v60 = vadd.f32 %v1810_v15, %v1809_v54  ;;  %v1502_v19 = vrot.slane %v1501_v36, 1  ;;  %v1077_v25 = vmul.f32 %v2798_v29, %v2973_v27  ;;  %v1158_v9 = vmul.f32 %v2792_v49, %v2973_v27 }
 0x368   :  { %v1583_v6 = vrot.slane %v1582_v23, 1  ;;  %v1731_v39 = vrot.slane %v1730_v4, 2  ;;  %v1484_v52 = vmul.f32 %v2759_v3, %v1455_v58  ;;  %v1565_v10 = vmul.f32 %v2752_v42, %v1455_v58 }
 0x369   :  { %v1812_v11 = vrot.slane %v1811_v60, 2  ;;  %v3018_v5 = vsel %vm175_vm4, %v1727_v46, %v1759_v53  ;;  %v3020_v62 = vadd.f32 %v1502_v19, %v1501_v36  ;;  %v1091_v32 = vsel %vm126_vm0, %v1077_v25, 0.0 }
 0x36a   :  { %v1172_v51 = vsel %vm126_vm0, %v1158_v9, 0.0  ;;  %v1732_v29 = vadd.f32 %v1731_v39, %v1730_v4  ;;  %v1092_v2 = vrot.slane %v1091_v32, 4  ;;  %v1504_v27 = vsel %vm126_vm0, %v1484_v52, 0.0 }
 0x36b   :  { %v1813_v24 = vadd.f32 %v1812_v11, %v1811_v60  ;;  %v1173_v49 = vrot.slane %v1172_v51, 4  ;;  %v1585_v3 = vsel %vm126_vm0, %v1565_v10, 0.0  ;;  %v1486_v42 = vmul.f32 %v2850_v21, %v1465_v50 }
 0x36c   :  { %v1567_v57 = vmul.f32 %v2844_v12, %v1465_v50  ;;  %v3028_v54 = vadd.f32 %v1583_v6, %v1582_v23  ;;  %v1733_v43 = vrot.slane %v1732_v29, 1  ;;  %v1093_v16 = vadd.f32 %v1092_v2, %v1091_v32 }
 0x36d   :  { %v1174_v18 = vadd.f32 %v1173_v49, %v1172_v51  ;;  %v1505_v37 = vrot.slane %v1504_v27, 4  ;;  %v1586_v33 = vrot.slane %v1585_v3, 4  ;;  %v1518_v35 = vsel %vm126_vm0, %v1486_v42, 0.0 }
 0x36e   :  { %v1599_v22 = vsel %vm126_vm0, %v1567_v57, 0.0  ;;  %v3032_v15 = vadd.f32 %v1733_v43, %v1732_v29  ;;  %v1814_v26 = vrot.slane %v1813_v24, 1  ;;  %v1094_v34 = vrot.slane %v1093_v16, 2  ;;  %v3034_v36 = vpop.permute.xlu0 %1073 }
 0x36f   :  { %v1175_v46 = vrot.slane %v1174_v18, 2  ;;  %v1506_v21 = vadd.f32 %v1505_v37, %v1504_v27  ;;  %v1587_v12 = vadd.f32 %v1586_v33, %v1585_v3  ;;  %v1519_v23 = vrot.slane %v1518_v35, 4 }
 0x370   :  { %v1600_v58 = vrot.slane %v1599_v22, 4  ;;  %v1095_v53 = vadd.f32 %v1094_v34, %v1093_v16  ;;  %v1079_v60 = vmul.f32 %v2818_v63, %v2989_v28  ;;  %v1160_v19 = vmul.f32 %v2812_v17, %v2989_v28 }
 0x371   :  { %v1176_v4 = vadd.f32 %v1175_v46, %v1174_v18  ;;  %v1507_v6 = vrot.slane %v1506_v21, 2  ;;  %v1588_v25 = vrot.slane %v1587_v12, 2  ;;  %v1520_v9 = vadd.f32 %v1519_v23, %v1518_v35 }
 0x372   :  { %v1601_v39 = vadd.f32 %v1600_v58, %v1599_v22  ;;  %v1096_v11 = vrot.slane %v1095_v53, 1  ;;  %v1105_v10 = vsel %vm126_vm0, %v1079_v60, 0.0  ;;  %v1186_v50 = vsel %vm126_vm0, %v1160_v19, 0.0  ;;  %v1470_v22 = vpop.permute.xlu2 %1469  ;;  %v1480_v58 = vpop.permute.xlu1 %1479 }
 0x373   :  { %v1177_v52 = vrot.slane %v1176_v4, 1  ;;  %v1508_v32 = vadd.f32 %v1507_v6, %v1506_v21  ;;  %v1589_v51 = vadd.f32 %v1588_v25, %v1587_v12  ;;  %v1521_v29 = vrot.slane %v1520_v9, 2 }
 0x374   :  { %v1602_v2 = vrot.slane %v1601_v39, 2  ;;  %v1097_v49 = vadd.f32 %v1096_v11, %v1095_v53  ;;  %v1106_v3 = vrot.slane %v1105_v10, 4  ;;  %v1187_v42 = vrot.slane %v1186_v50, 4 }
 0x375   :  { %v1178_v27 = vadd.f32 %v1177_v52, %v1176_v4  ;;  %v1509_v57 = vrot.slane %v1508_v32, 1  ;;  %v1590_v28 = vrot.slane %v1589_v51, 1  ;;  %v1522_v43 = vadd.f32 %v1521_v29, %v1520_v9 }
 0x376   :  { %v1603_v16 = vadd.f32 %v1602_v2, %v1601_v39  ;;  %v1148_v18 = vsel %vm169_vm1, %v1097_v49, %v2957_v8  ;;  %v1107_v33 = vadd.f32 %v1106_v3, %v1105_v10  ;;  %v1188_v35 = vadd.f32 %v1187_v42, %v1186_v50  ;;  %v3046_v34 = vpop.permute.xlu0 %1444 }
 0x377   :  { %v1229_v37 = vsel %vm169_vm1, %v1178_v27, %v2959_v55  ;;  %v3048_v46 = vadd.f32 %v1814_v26, %v1813_v24  ;;  %v3050_v21 = vadd.f32 %v1509_v57, %v1508_v32  ;;  %v3052_v12 = vadd.f32 %v1590_v28, %v1589_v51 }
 0x378   :  { %v1523_v23 = vrot.slane %v1522_v43, 1  ;;  %v1604_v53 = vrot.slane %v1603_v16, 1  ;;  %v1149_v8 = vsel %vm171_vm2, %v2963_v56, %v1148_v18  ;;  %v1108_v4 = vrot.slane %v1107_v33, 2 }
 0x379   :  { %v1189_v60 = vrot.slane %v1188_v35, 2  ;;  %v1230_v19 = vsel %vm171_vm2, %v2965_v1, %v1229_v37  ;;  %v1487_v24 = vmul.f32 %v2830_v47, %v1470_v22  ;;  %v1568_v26 = vmul.f32 %v2806_v45, %v1470_v22 }
 0x37a   :  { %v3056_v55 = vadd.f32 %v1523_v23, %v1522_v43  ;;  %v1109_v6 = vadd.f32 %v1108_v4, %v1107_v33  ;;  %v1489_v9 = vmul.f32 %v2864_v48, %v1480_v58  ;;  %v1570_v39 = vmul.f32 %v2858_v40, %v1480_v58  ;;  %v1678_v22 = vpop.permute.xlu2 %1677 }
 0x37b   :  { %v1190_v25 = vadd.f32 %v1189_v60, %v1188_v35  ;;  %v1525_v11 = vsel %vm126_vm0, %v1487_v24, 0.0  ;;  %v1606_v56 = vsel %vm126_vm0, %v1568_v26, 0.0  ;;  %v1081_v52 = vmul.f32 %v2830_v47, %v3009_v44 }
 0x37c   :  { %v1162_v1 = vmul.f32 %v2806_v45, %v3009_v44  ;;  %v1110_v10 = vrot.slane %v1109_v6, 1  ;;  %v1526_v32 = vrot.slane %v1525_v11, 4  ;;  %v1607_v51 = vrot.slane %v1606_v56, 4 }
 0x37d   :  { %v1191_v50 = vrot.slane %v1190_v25, 1  ;;  %v1539_v29 = vsel %vm126_vm0, %v1489_v9, 0.0  ;;  %v1620_v2 = vsel %vm126_vm0, %v1570_v39, 0.0  ;;  %v1119_v49 = vsel %vm126_vm0, %v1081_v52, 0.0 }
 0x37e   :  { %v1200_v27 = vsel %vm126_vm0, %v1162_v1, 0.0  ;;  %v1111_v3 = vadd.f32 %v1110_v10, %v1109_v6  ;;  %v1527_v57 = vadd.f32 %v1526_v32, %v1525_v11  ;;  %v1608_v28 = vadd.f32 %v1607_v51, %v1606_v56  ;;  %v1460_v23 = vpop.permute.xlu0 %1459 }
 0x37f   :  { %v1192_v42 = vadd.f32 %v1191_v50, %v1190_v25  ;;  %v1540_v47 = vrot.slane %v1539_v29, 4  ;;  %v1621_v43 = vrot.slane %v1620_v2, 4  ;;  %v1120_v18 = vrot.slane %v1119_v49, 4 }
 0x380   :  { %v1201_v45 = vrot.slane %v1200_v27, 4  ;;  %v3074_v44 = vadd.f32 %v1604_v53, %v1603_v16  ;;  %v1150_v37 = vsel %vm173_vm3, %v1111_v3, %v1149_v8  ;;  %v1528_v33 = vrot.slane %v1527_v57, 2 }
 0x381   :  { %v1609_v35 = vrot.slane %v1608_v28, 2  ;;  %v1231_v58 = vsel %vm173_vm3, %v1192_v42, %v1230_v19  ;;  %v1541_v4 = vadd.f32 %v1540_v47, %v1539_v29  ;;  %v1622_v60 = vadd.f32 %v1621_v43, %v1620_v2 }
 0x382   :  { %v1151_v24 = vsel %vm175_vm4, %v2977_v0, %v1150_v37  ;;  %v1529_v26 = vadd.f32 %v1528_v33, %v1527_v57  ;;  %v1121_v25 = vadd.f32 %v1120_v18, %v1119_v49  ;;  %v1202_v9 = vadd.f32 %v1201_v45, %v1200_v27 }
 0x383   :  { %v1610_v6 = vadd.f32 %v1609_v35, %v1608_v28  ;;  %v1542_v39 = vrot.slane %v1541_v4, 2  ;;  %v1623_v16 = vrot.slane %v1622_v60, 2  ;;  %v1691_v53 = vmul.f32 %v2878_v20, %v1678_v22 }
 0x384   :  { %v1772_v8 = vmul.f32 %v2884_v38, %v1678_v22  ;;  %v1530_v11 = vrot.slane %v1529_v26, 1  ;;  %v1122_v52 = vrot.slane %v1121_v25, 2  ;;  %v1203_v1 = vrot.slane %v1202_v9, 2 }
 0x385   :  { %v1611_v56 = vrot.slane %v1610_v6, 1  ;;  %v1543_v19 = vadd.f32 %v1542_v39, %v1541_v4  ;;  %v1624_v10 = vadd.f32 %v1623_v16, %v1622_v60  ;;  %v1735_v50 = vsel %vm126_vm0, %v1691_v53, 0.0  ;;  %v1960_v53 = vld [vmem:[%s3203_s1] sm:$0x1f] }
 0x386   :  { %v1816_v0 = vsel %vm126_vm0, %v1772_v8, 0.0  ;;  %v3084_v32 = vadd.f32 %v1530_v11, %v1529_v26  ;;  %v1232_v51 = vsel %vm175_vm4, %v2979_v7, %v1231_v58  ;;  %v1123_v29 = vadd.f32 %v1122_v52, %v1121_v25  ;;  %v1475_v4 = vpop.permute.xlu0 %1474 }
 0x387   :  { %v1204_v2 = vadd.f32 %v1203_v1, %v1202_v9  ;;  %v1544_v49 = vrot.slane %v1543_v19, 1  ;;  %v1625_v27 = vrot.slane %v1624_v10, 1  ;;  %v1736_v3 = vrot.slane %v1735_v50, 4 }
 0x388   :  { %v1817_v42 = vrot.slane %v1816_v0, 4  ;;  %v1124_v57 = vrot.slane %v1123_v29, 1  ;;  %v1083_v47 = vmul.f32 %v2864_v48, %v3034_v36  ;;  %v1164_v43 = vmul.f32 %v2858_v40, %v3034_v36 }
 0x389   :  { %v1205_v28 = vrot.slane %v1204_v2, 1  ;;  %v3092_v18 = vadd.f32 %v1611_v56, %v1610_v6  ;;  %v3094_v45 = vadd.f32 %v1544_v49, %v1543_v19  ;;  %v1737_v37 = vadd.f32 %v1736_v3, %v1735_v50  ;;  %v1959_v6 = vld [vmem:[%s3202_s0] sm:$0x1f] }
 0x38a   :  { %v1818_v7 = vadd.f32 %v1817_v42, %v1816_v0  ;;  %v1125_v33 = vadd.f32 %v1124_v57, %v1123_v29  ;;  %v1133_v22 = vsel %vm126_vm0, %v1083_v47, 0.0  ;;  %v1214_v58 = vsel %vm126_vm0, %v1164_v43, 0.0 }
 0x38b   :  { %v1206_v35 = vadd.f32 %v1205_v28, %v1204_v2  ;;  %v1738_v60 = vrot.slane %v1737_v37, 2  ;;  %v1134_v25 = vrot.slane %v1133_v22, 4  ;;  %v1215_v9 = vrot.slane %v1214_v58, 4 }
 0x38c   :  { %v1819_v26 = vrot.slane %v1818_v7, 2  ;;  %v3098_v39 = vadd.f32 %v1625_v27, %v1624_v10  ;;  %v3101_v36 = vsel %vm177_vm5, %v1125_v33, %v1151_v24  ;;  %v1482_v16 = vmul.f32 %v1959_v6, %v3046_v34 }
 0x38d   :  { %v1563_v8 = vmul.f32 %v1960_v53, %v3046_v34  ;;  %v1739_v11 = vadd.f32 %v1738_v60, %v1737_v37  ;;  %v1135_v52 = vadd.f32 %v1134_v25, %v1133_v22  ;;  %v1216_v1 = vadd.f32 %v1215_v9, %v1214_v58 }
 0x38e   :  { %v3111_v56 = vadd.f32 %v1819_v26, %v1818_v7  ;;  %v1490_v24 = vsel %vm126_vm0, %v1482_v16, 0.0  ;;  %v1485_v10 = vmul.f32 %v2818_v63, %v1460_v23  ;;  %v1566_v50 = vmul.f32 %v2812_v17, %v1460_v23  ;;  %v1683_v25 = vpop.permute.xlu0 %1682 }
 0x38f   :  { %v1571_v19 = vsel %vm126_vm0, %v1563_v8, 0.0  ;;  %v3118_v0 = vsel %vm177_vm5, %v1206_v35, %v1232_v51  ;;  %v1740_v29 = vrot.slane %v1739_v11, 1  ;;  %v1136_v2 = vrot.slane %v1135_v52, 2 }
 0x390   :  { %v1217_v49 = vrot.slane %v1216_v1, 2  ;;  %v1491_v34 = vrot.slane %v1490_v24, 4  ;;  %v1572_v27 = vrot.slane %v1571_v19, 4  ;;  %v1511_v3 = vsel %vm126_vm0, %v1485_v10, 0.0 }
 0x391   :  { %v1592_v42 = vsel %vm126_vm0, %v1566_v50, 0.0  ;;  %v3122_v57 = vadd.f32 %v1740_v29, %v1739_v11  ;;  %v1821_v28 = vrot.slane %v3111_v56, 1  ;;  %v1137_v47 = vadd.f32 %v1136_v2, %v1135_v52 }
 0x392   :  { %v1218_v63 = vadd.f32 %v1217_v49, %v1216_v1  ;;  %v1492_v43 = vadd.f32 %v1491_v34, %v1490_v24  ;;  %v1573_v17 = vadd.f32 %v1572_v27, %v1571_v19  ;;  %v1512_v23 = vrot.slane %v1511_v3, 4 }
 0x393   :  { %v1593_v51 = vrot.slane %v1592_v42, 4  ;;  %v1138_v37 = vrot.slane %v1137_v47, 1  ;;  %v1488_v33 = vmul.f32 %v2884_v38, %v1475_v4  ;;  %v1569_v35 = vmul.f32 %v2878_v20, %v1475_v4 }
 0x394   :  { %v1219_v7 = vrot.slane %v1218_v63, 1  ;;  %v1493_v22 = vrot.slane %v1492_v43, 2  ;;  %v1574_v58 = vrot.slane %v1573_v17, 2  ;;  %v1513_v60 = vadd.f32 %v1512_v23, %v1511_v3 }
 0x395   :  { %v1594_v26 = vadd.f32 %v1593_v51, %v1592_v42  ;;  %v1139_v9 = vadd.f32 %v1138_v37, %v1137_v47  ;;  %v1532_v16 = vsel %vm126_vm0, %v1488_v33, 0.0  ;;  %v1613_v53 = vsel %vm126_vm0, %v1569_v35, 0.0 }
 0x396   :  { %v1220_v6 = vadd.f32 %v1219_v7, %v1218_v63  ;;  %v1494_v8 = vadd.f32 %v1493_v22, %v1492_v43  ;;  %v1575_v11 = vadd.f32 %v1574_v58, %v1573_v17  ;;  %v1514_v52 = vrot.slane %v1513_v60, 2 }
 0x397   :  { %v1595_v1 = vrot.slane %v1594_v26, 2  ;;  %v1533_v24 = vrot.slane %v1532_v16, 4  ;;  %v1614_v19 = vrot.slane %v1613_v53, 4  ;;  %v1692_v38 = vmul.f32 %v2858_v40, %v1683_v25 }
 0x398   :  { %v1773_v20 = vmul.f32 %v2864_v48, %v1683_v25  ;;  %v1495_v4 = vrot.slane %v1494_v8, 1  ;;  %v1576_v10 = vrot.slane %v1575_v11, 1  ;;  %v1515_v50 = vadd.f32 %v1514_v52, %v1513_v60 }
 0x399   :  { %v1596_v29 = vadd.f32 %v1595_v1, %v1594_v26  ;;  %v1534_v2 = vadd.f32 %v1533_v24, %v1532_v16  ;;  %v1615_v49 = vadd.f32 %v1614_v19, %v1613_v53  ;;  %v1742_v34 = vsel %vm126_vm0, %v1692_v38, 0.0 }
 0x39a   :  { %v1823_v27 = vsel %vm126_vm0, %v1773_v20, 0.0  ;;  %v1496_v3 = vadd.f32 %v1495_v4, %v1494_v8  ;;  %v1577_v42 = vadd.f32 %v1576_v10, %v1575_v11  ;;  %v1516_v47 = vrot.slane %v1515_v50, 1 }
 0x39b   :  { %v1597_v63 = vrot.slane %v1596_v29, 1  ;;  %v1535_v43 = vrot.slane %v1534_v2, 2  ;;  %v1616_v17 = vrot.slane %v1615_v49, 2  ;;  %v1743_v23 = vrot.slane %v1742_v34, 4 }
 0x39c   :  { %v1824_v40 = vrot.slane %v1823_v27, 4  ;;  %v1554_v48 = vsel %vm169_vm1, %v3020_v62, %v1496_v3  ;;  %v1635_v51 = vsel %vm169_vm1, %v3028_v54, %v1577_v42  ;;  %v1517_v37 = vadd.f32 %v1516_v47, %v1515_v50 }
 0x39d   :  { %v1598_v7 = vadd.f32 %v1597_v63, %v1596_v29  ;;  %v1555_v33 = vsel %vm171_vm2, %v3050_v21, %v1554_v48  ;;  %v1636_v35 = vsel %vm171_vm2, %v3052_v12, %v1635_v51  ;;  %v1536_v22 = vadd.f32 %v1535_v43, %v1534_v2  ;;  %v1961_v29 = vld [vmem:[%s3205_s4] sm:$0xff] }
 0x39e   :  { %v1617_v58 = vadd.f32 %v1616_v17, %v1615_v49  ;;  %v1556_v60 = vsel %vm173_vm3, %v1517_v37, %v1555_v33  ;;  %v1744_v25 = vadd.f32 %v1743_v23, %v1742_v34  ;;  %v1825_v16 = vadd.f32 %v1824_v40, %v1823_v27 }
 0x39f   :  { %v1637_v26 = vsel %vm173_vm3, %v1598_v7, %v1636_v35  ;;  %v1537_v62 = vrot.slane %v1536_v22, 1  ;;  %v1153_v54 = vsel %vm179_vm6, %v2995_v59, %v3101_v36  ;;  %v1234_v21 = vsel %vm179_vm6, %v2997_v31, %v3118_v0 }
 0x3a0   :  { %v1618_v53 = vrot.slane %v1617_v58, 1  ;;  %v1745_v8 = vrot.slane %v1744_v25, 2  ;;  %v1826_v12 = vrot.slane %v1825_v16, 2  ;;  %v1154_v11 = vsel %vm181_vm7, %v1139_v9, %v1153_v54 }
 0x3a1   :  { %v1235_v52 = vsel %vm181_vm7, %v1220_v6, %v1234_v21  ;;  %v1538_v1 = vadd.f32 %v1537_v62, %v1536_v22  ;;  %v1156_v19 = vmul.f32 %v2916_v41, %v1154_v11  ;;  %v1557_v59 = vsel %vm175_vm4, %v3056_v55, %v1556_v60 }
 0x3a2   :  { %v1619_v24 = vadd.f32 %v1618_v53, %v1617_v58  ;;  %v1237_v38 = vmul.f32 %v2922_v13, %v1235_v52  ;;  %v1746_v20 = vadd.f32 %v1745_v8, %v1744_v25  ;;  %v1827_v4 = vadd.f32 %v1826_v12, %v1825_v16 }
 0x3a3   :  { %v1638_v31 = vsel %vm175_vm4, %v3074_v44, %v1637_v26  ;;  %v1822_v36 = vadd.f32 %v1821_v28, %v3111_v56  ;;  %v1558_v9 = vsel %vm177_vm5, %v3084_v32, %v1557_v59  ;;  %v1841_v44 = vsel %vm175_vm4, %v3001_v14, %v3007_v61  ;;  %v1962_v14 = vld [vmem:[%s3206_s5] sm:$0xff] }
 0x3a4   :  { %v1238_v0 = vsub.f32 %v1156_v19, %v1237_v38  ;;  %v1639_v41 = vsel %vm177_vm5, %v3092_v18, %v1638_v31  ;;  %v1747_v13 = vrot.slane %v1746_v20, 1  ;;  %v1828_v6 = vrot.slane %v1827_v4, 1 }
 0x3a5   :  { %v1559_v10 = vsel %vm179_vm6, %v1538_v1, %v1558_v9  ;;  %v1640_v55 = vsel %vm179_vm6, %v1619_v24, %v1639_v41  ;;  %v1761_v32 = vsel %vm177_vm5, %v3032_v15, %v3018_v5  ;;  %v1963_v5 = vld [vmem:[%s3201_s6] sm:$0xff] }
 0x3a6   :  { %v1560_v56 = vsel %vm181_vm7, %v3094_v45, %v1559_v10  ;;  %v1641_v28 = vsel %vm181_vm7, %v3098_v39, %v1640_v55  ;;  %v1748_v18 = vadd.f32 %v1747_v13, %v1746_v20  ;;  %v1829_v50 = vadd.f32 %v1828_v6, %v1827_v4 }
 0x3a7   :  { %v1562_v2 = vmul.f32 %v1961_v29, %v1560_v56  ;;  %v1643_v61 = vmul.f32 %v1962_v14, %v1641_v28  ;;  %v1762_v45 = vsel %vm179_vm6, %v3122_v57, %v1761_v32  ;;  %v1842_v39 = vsel %vm177_vm5, %v3048_v46, %v1841_v44  ;;  %v1964_v46 = vld [vmem:[%s3204_s7] sm:$0xff] }
 0x3a8   :  { %v1848_v15 = vadd.f32 %v1963_v5, %v1238_v0  ;;  %v1763_v34 = vsel %vm181_vm7, %v1748_v18, %v1762_v45  ;;  %v1843_v27 = vsel %vm179_vm6, %v1822_v36, %v1842_v39  ;;  %v1853_v17 = vadd.f32 %v1964_v46, %v2925_v30 }
 0x3a9   :  { %v1644_v49 = vsub.f32 %v1562_v2, %v1643_v61  ;;  %v1765_v3 = vmul.f32 %v1961_v29, %v1763_v34  ;;  %v1844_v42 = vsel %vm181_vm7, %v1829_v50, %v1843_v27 }
 0x3aa   :  { %v1846_v63 = vmul.f32 %v1962_v14, %v1844_v42 }
 0x3ab   :  { %v1849_v47 = vsub.f32 %v1848_v15, %v1644_v49 }
 0x3ac   :  { %v1847_v57 = vadd.f32 %v1846_v63, %v1765_v3 }
 0x3ad   :  { %v1850_v43 = vand.u32 2147483647, %v1849_v47 }
 0x3ae   :  { %v1854_v23 = vadd.f32 %v1853_v17, %v1847_v57 }
 0x3af   :  { %1851 = vadd.xlane.f32.xlu2 %v1850_v43 }
 0x3b0   :  { %v1855_v40 = vand.u32 2147483647, %v1854_v23 }
 0x3b2   :  { %1856 = vadd.xlane.f32.xlu1 %v1855_v40 }
 0x422   :  { %v1852_v48 = vpop.xlane.xlu2 %1851 }
 0x425   :  { %v1857_v51 = vpop.xlane.xlu1 %1856 }
 0x426   :  { %v1858_v37 = vadd.f32 %v1857_v51, %v1852_v48 }
 0x428   :  { %1860 = vst.msk [vmem:[%s3207_s8] sm:$0xff] %vm1859_vm9, %v1858_v37 }

</bundles_post_ra>
